<compile_context>
chip_gen: v7x
topology: tpu7x:2x2x1
jax: 0.10.0
libtpu: 0.0.40
codegen_flags: <defaults>
</compile_context>

<pallas_src>
import jax
import jax.numpy as jnp
from jax import lax
from jax.experimental import pallas as pl
from jax.experimental.pallas import tpu as pltpu


def _round_up(x, m):
    return (x + m - 1) // m * m


def _full_spec(shape):
    # whole-array block, grid=(1,) -> bypasses (8,128) tiling constraint for odd shapes
    return pl.BlockSpec(shape, lambda i: (0,) * len(shape))


def _pad2(x, rows, cols):
    r, c = x.shape
    return jnp.pad(x, ((0, rows - r), (0, cols - c)))


# ---------------------------------------------------------------------------
# Fused forward kernel factory (n_layers / shapes are static at trace time)
# ---------------------------------------------------------------------------
def _make_fused_kernel(n_layers, hidden_dim, d_pad, n_edges, e_pad, n_seed):
    bf16 = jnp.bfloat16

    def kernel(x_ref, pw_ref, pb_ref, a_ref, w_ref, b_ref, eidx_ref, bdelta_ref, out_ref):
        # ---- LinearProjector (h_item_dst is just a prefix slice; no 2nd projection) ----
        h_item = (jnp.dot(x_ref[...], pw_ref[...], preferred_element_type=jnp.float32)
                  + pb_ref[...])                                     # (R, d_pad) f32

        # lane==hidden_dim mask, built ONCE and reused by every layer (no per-layer iota)
        ws_mask = lax.broadcasted_iota(jnp.int32, (1, d_pad), 1) == hidden_dim

        a_all = a_ref[...]          # (L, R, R)            bf16
        w_all = w_ref[...]          # (L, 3*d_pad, d_pad)  bf16  rows: [qw ; wn ; wh]
        b_all = b_ref[...]          # (L, 2, d_pad)        f32   rows: [qb, wb]

        # ---- SAGENet: all rows kept at R; padded rows stay finite garbage that the
        #      zero-padded A columns can never propagate into valid rows. ----
        h = h_item
        for l in range(n_layers):
            a_l = a_all[l]                              # (R, R) bf16
            qw = w_all[l, 0:d_pad, :]                   # (d_pad, d_pad) bf16
            wnh = w_all[l, d_pad:, :]                   # (2*d_pad, d_pad) bf16
            qb = b_all[l, 0:1, :]                       # (1, d_pad) f32, lane hid == 1.0
            wb = b_all[l, 1:2, :]                       # (1, d_pad) f32

            # qb spare lane == 1 and qw column `hidden_dim` == 0  =>  n lane hid == 1,
            # so agg = A @ n carries row-sum(A) in that lane with zero extra VPU work.
            n = jnp.maximum(
                jnp.dot(h.astype(bf16), qw, preferred_element_type=jnp.float32) + qb, 0.0)
            agg = jnp.dot(a_l, n.astype(bf16), preferred_element_type=jnp.float32)

            ws = jnp.sum(jnp.where(ws_mask, agg, 0.0), axis=1, keepdims=True)
            inv_ws = pl.reciprocal(jnp.maximum(ws, 1.0), approx=True)   # EUP

            # Fused wn/wh matmul: K = 2*d_pad fills the 256-deep MXU on v6e/v7x.
            # (wn row `hidden_dim` is zero-padded, so the ws lane contributes nothing.)
            zin = jnp.concatenate(
                [(agg * inv_ws).astype(bf16), h.astype(bf16)], axis=1)  # (R, 2*d_pad)
            z = jnp.maximum(
                jnp.dot(zin, wnh, preferred_element_type=jnp.float32) + wb, 0.0)

            ssq = jnp.sum(z * z, axis=1, keepdims=True)
            inv_norm = jnp.where(ssq == 0.0, 1.0, lax.rsqrt(ssq))       # EUP
            h = z * inv_norm

        h_final = h_item[:n_seed, :] + h[:n_seed, :]     # (n_seed, d_pad), pads are 0

        # ---- ItemToItemScorer + margin, fused, lane-dense (edges along lanes) ----
        hf_b = h_final.astype(bf16)
        g = jnp.einsum('sd,td->st', hf_b, hf_b,
                       preferred_element_type=jnp.float32)              # (ns, ns) Gram
        g_b = g.astype(bf16)

        eidx = eidx_ref[...]                                            # (4, e_pad) i32
        sub = lax.broadcasted_iota(jnp.int32, (n_seed, e_pad), 0)       # built once

        def edge_dot(u_row, v_row):                     # padded edges (-1) -> all-zero sel
            sel_v = (sub == v_row).astype(bf16)                          # (ns, e_pad)
            sel_u = (sub == u_row).astype(jnp.float32)
            gp = jnp.dot(g_b, sel_v, preferred_element_type=jnp.float32)  # col e = g[:, v_e]
            return jnp.sum(sel_u * gp, axis=0, keepdims=True)             # (1, e_pad)

        pos = edge_dot(eidx[0:1, :], eidx[1:2, :])
        neg = edge_dot(eidx[2:3, :], eidx[3:4, :])

        # bias[nid_u] + bias[nid_v] is a pure index lookup -> precomputed in the wrapper
        # and passed as one lane-dense (neg - pos) delta row.
        margin = jnp.maximum(neg - pos + bdelta_ref[...] + 1.0, 0.0)
        lane_e = lax.broadcasted_iota(jnp.int32, (1, e_pad), 1)
        out_ref[...] = jnp.where(lane_e < n_edges, margin, 0.0)          # mask pad lanes

    return kernel


# ---------------------------------------------------------------------------
# Full model forward (single pallas_call)
# ---------------------------------------------------------------------------
def pinsage_forward(params, x_src, block_adjs, dst_counts, pos_edges, neg_edges, nids):
    # dst_counts must be static Python ints (used as slice bounds).
    dst_counts = [int(c) for c in dst_counts]
    n_layers = len(block_adjs)
    n_seed = dst_counts[-1]
    feat_dim = x_src.shape[1]
    hidden_dim = params["proj_w"].shape[1]
    n_edges = int(pos_edges[0].shape[0])
    bf16 = jnp.bfloat16

    f_pad = _round_up(feat_dim, 128)
    d_pad = _round_up(hidden_dim + 1, 128)      # +1 spare lane carries the A row-sums
    e_pad = _round_up(n_edges, 128)
    # one uniform padded node-row count for every block (lane-aligned A, no row slicing)
    R = _round_up(max([x_src.shape[0]] + [a.shape[0] for a in block_adjs]
                      + [a.shape[1] for a in block_adjs]), 128)

    # --- node features: rows padded to R, lanes to f_pad, bf16 MXU operand ----------
    x_pad = _pad2(x_src.astype(jnp.float32), R, f_pad).astype(bf16)
    pw = _pad2(params["proj_w"], f_pad, d_pad).astype(bf16)
    pb = _pad2(params["proj_b"], 1, d_pad)                      # f32 (added post-matmul)

    # --- per-layer weights packed into one bf16 slab [qw ; wn ; wh] + one f32 bias slab
    w_rows, b_rows = [], []
    for lp in params["sage"]:
        qw = _pad2(lp["qw"], d_pad, d_pad)
        wn = _pad2(lp["wn"], d_pad, d_pad)
        wh = _pad2(lp["wh"], d_pad, d_pad)
        w_rows.append(jnp.concatenate([qw, wn, wh], axis=0))    # (3*d_pad, d_pad)
        qb = _pad2(lp["qb"], 1, d_pad).at[0, hidden_dim].set(1.0)   # spare lane = 1
        wb = _pad2(lp["wb"], 1, d_pad)
        b_rows.append(jnp.concatenate([qb, wb], axis=0))        # (2, d_pad)
    w_slab = jnp.stack(w_rows).astype(bf16)                     # (L, 3*d_pad, d_pad)
    b_slab = jnp.stack(b_rows)                                  # (L, 2, d_pad) f32

    # --- adjacency slab: every A_l zero-padded to lane-aligned (R, R), bf16 ----------
    a_slab = jnp.stack([_pad2(a.astype(jnp.float32), R, R)
                        for a in block_adjs]).astype(bf16)      # (L, R, R)

    # --- edges: one (4, e_pad) int32 slab (pu, pv, nu, nv); pad lanes = -1 -----------
    def pad_idx(idx):
        return jnp.full((e_pad,), -1, jnp.int32).at[:n_edges].set(idx.astype(jnp.int32))
    eidx = jnp.stack([pad_idx(pos_edges[0]), pad_idx(pos_edges[1]),
                      pad_idx(neg_edges[0]), pad_idx(neg_edges[1])])

    # --- scorer bias: pure index lookup -> wrapper-side gather (essentially free) ----
    bias = params["scorer_bias"]
    nids = nids.astype(jnp.int32)
    pos_b = bias[nids[pos_edges[0]]] + bias[nids[pos_edges[1]]]
    neg_b = bias[nids[neg_edges[0]]] + bias[nids[neg_edges[1]]]
    bdelta = jnp.zeros((1, e_pad), jnp.float32).at[0, :n_edges].set(neg_b - pos_b)

    inputs = [x_pad, pw, pb, a_slab, w_slab, b_slab, eidx, bdelta]

    kernel = _make_fused_kernel(n_layers=n_layers, hidden_dim=hidden_dim, d_pad=d_pad,
                                n_edges=n_edges, e_pad=e_pad, n_seed=n_seed)

    in_bytes = sum(int(a.size) * int(a.dtype.itemsize) for a in inputs)
    out_bytes = e_pad * 4
    flops = 2 * (R * f_pad * d_pad
                 + n_layers * (R * d_pad * d_pad + R * R * d_pad + R * 2 * d_pad * d_pad)
                 + n_seed * n_seed * d_pad + 2 * n_seed * n_seed * e_pad)
    cost = pl.CostEstimate(flops=flops, transcendentals=2 * n_layers * R,
                           bytes_accessed=in_bytes + out_bytes)

    out_row = pl.pallas_call(
        kernel,
        grid=(1,),
        in_specs=[_full_spec(a.shape) for a in inputs],
        out_specs=_full_spec((1, e_pad)),
        out_shape=jax.ShapeDtypeStruct((1, e_pad), jnp.float32),
        compiler_params=pltpu.CompilerParams(
            dimension_semantics=("arbitrary",),
            vmem_limit_bytes=int(4 * (in_bytes + out_bytes)) + (8 << 20)),
        cost_estimate=cost,
    )(*inputs)

    return out_row[0, :n_edges][:, None]                        # (E, 1), original layout


# ---------------------------------------------------------------------------
# Pure-JAX f32 reference (mirrors the PyTorch module)
# ---------------------------------------------------------------------------
def pinsage_reference(params, x_src, block_adjs, dst_counts, pos_edges, neg_edges, nids):
    def proj(x):
        return x @ params["proj_w"] + params["proj_b"]

    h_item = proj(x_src)
    h = h_item
    for lp, a, nd in zip(params["sage"], block_adjs, dst_counts):
        h_dst = h[:nd]
        n = jnp.maximum(h @ lp["qw"] + lp["qb"], 0.0)
        agg = a @ n
        ws = jnp.maximum(jnp.sum(a, axis=1, keepdims=True), 1.0)
        z = jnp.maximum((agg / ws) @ lp["wn"] + h_dst @ lp["wh"] + lp["wb"], 0.0)
        zn = jnp.sqrt(jnp.sum(z * z, axis=1, keepdims=True))
        zn = jnp.where(zn == 0.0, 1.0, zn)
        h = z / zn
    n_seed = dst_counts[-1]
    h_final = proj(x_src[:n_seed]) + h
    bias = params["scorer_bias"]

    def sc(edges):
        u, v = edges
        return jnp.sum(h_final[u] * h_final[v], axis=1) + bias[nids[u]] + bias[nids[v]]

    return jnp.maximum(sc(neg_edges) - sc(pos_edges) + 1.0, 0.0)[:, None]


# ---------------------------------------------------------------------------
# Deterministic parameter / input construction
# ---------------------------------------------------------------------------
def init_params(key, feat_dim, hidden_dim, n_layers, n_nodes):
    ks = jax.random.split(key, 2 + 5 * n_layers)
    s = 0.05
    params = {
        "proj_w": s * jax.random.normal(ks[0], (feat_dim, hidden_dim), jnp.float32),
        "proj_b": s * jax.random.normal(ks[1], (1, hidden_dim), jnp.float32),
        "scorer_bias": jnp.zeros((n_nodes,), jnp.float32),  # nn.Parameter(torch.zeros(n))
        "sage": [],
    }
    for l in range(n_layers):
        kq, kqb, kwn, kwh, kwb = ks[2 + 5 * l: 2 + 5 * (l + 1)]
        params["sage"].append({
            "qw": s * jax.random.normal(kq, (hidden_dim, hidden_dim), jnp.float32),
            "qb": s * jax.random.normal(kqb, (1, hidden_dim), jnp.float32),
            "wn": s * jax.random.normal(kwn, (hidden_dim, hidden_dim), jnp.float32),
            "wh": s * jax.random.normal(kwh, (hidden_dim, hidden_dim), jnp.float32),
            "wb": s * jax.random.normal(kwb, (1, hidden_dim), jnp.float32),
        })
    return params


if __name__ == "__main__":
    key = jax.random.PRNGKey(0)

    feat_dim = 16
    hidden_dim = 32
    n_layers = 2
    n_nodes_full_graph = 100

    # blocks[0]: 64 src -> 32 dst ; blocks[1]: 32 src -> 16 dst (seeds)
    n_src0, n_dst0, n_dst1 = 64, 32, 16
    n_edges = 16

    k_feat, k_a0, k_m0, k_a1, k_m1, k_pe, k_ne, k_nid, k_par = jax.random.split(key, 9)

    x_src = jax.random.normal(k_feat, (n_src0, feat_dim), jnp.float32)

    a0 = (jax.random.uniform(k_a0, (n_dst0, n_src0)) *
          (jax.random.uniform(k_m0, (n_dst0, n_src0)) < 0.25)).astype(jnp.float32)
    a1 = (jax.random.uniform(k_a1, (n_dst1, n_dst0)) *
          (jax.random.uniform(k_m1, (n_dst1, n_dst0)) < 0.25)).astype(jnp.float32)
    block_adjs = [a0, a1]
    dst_counts = [n_dst0, n_dst1]

    # item-to-item edges between distinct seed items (as produced by the PinSAGE sampler)
    pu = jnp.arange(n_edges, dtype=jnp.int32)
    pv = (pu + jax.random.randint(k_pe, (n_edges,), 1, n_dst1, dtype=jnp.int32)) % n_dst1
    nu = pu
    nv = (pu + jax.random.randint(k_ne, (n_edges,), 1, n_dst1, dtype=jnp.int32)) % n_dst1
    pos_edges, neg_edges = (pu, pv), (nu, nv)
    nids = jax.random.randint(k_nid, (n_dst1,), 0, n_nodes_full_graph, dtype=jnp.int32)

    params = init_params(k_par, feat_dim, hidden_dim, n_layers, n_nodes_full_graph)

    out = pinsage_forward(params, x_src, block_adjs, dst_counts,
                          pos_edges, neg_edges, nids)
    out = jax.block_until_ready(out)

    ref = pinsage_reference(params, x_src, block_adjs, dst_counts,
                            pos_edges, neg_edges, nids)

    assert out.shape == (n_edges, 1) and bool(jnp.all(out >= 0.0))
    # Loose tolerance: every MXU operand is bf16 (per perf guidance) and the ws / norm
    # use the approximate EUP reciprocal / rsqrt; the reference is pure f32.
    assert bool(jnp.allclose(out, ref, atol=1e-1, rtol=1e-1))
    print("KERNEL_OK")
</pallas_src>

<mosaic_0001>
module attributes {stable_mosaic.version = 11 : i64} {
  func.func @kernel(%arg0: i32, %arg1: memref<128x128xbf16, #tpu.memory_space<vmem>>, %arg2: memref<128x128xbf16, #tpu.memory_space<vmem>>, %arg3: memref<1x128xf32, #tpu.memory_space<vmem>>, %arg4: memref<2x128x128xbf16, #tpu.memory_space<vmem>>, %arg5: memref<2x384x128xbf16, #tpu.memory_space<vmem>>, %arg6: memref<2x2x128xf32, #tpu.memory_space<vmem>>, %arg7: memref<4x128xi32, #tpu.memory_space<vmem>>, %arg8: memref<1x128xf32, #tpu.memory_space<vmem>>, %arg9: memref<1x128xf32, #tpu.memory_space<vmem>>) attributes {dimension_semantics = [#tpu.dimension_semantics<arbitrary>], iteration_bounds = array<i64: 1>, scalar_prefetch = 0 : i64, scratch_operands = 0 : i64, tpu.core_type = #tpu.core_type<tc>, window_params = [{pipeline_mode = #tpu.pipeline_mode<synchronous>, transform_indices = @transform_0, window_bounds = array<i64: 128, 128>}, {pipeline_mode = #tpu.pipeline_mode<synchronous>, transform_indices = @transform_1, window_bounds = array<i64: 128, 128>}, {pipeline_mode = #tpu.pipeline_mode<synchronous>, transform_indices = @transform_2, window_bounds = array<i64: 1, 128>}, {pipeline_mode = #tpu.pipeline_mode<synchronous>, transform_indices = @transform_3, window_bounds = array<i64: 2, 128, 128>}, {pipeline_mode = #tpu.pipeline_mode<synchronous>, transform_indices = @transform_4, window_bounds = array<i64: 2, 384, 128>}, {pipeline_mode = #tpu.pipeline_mode<synchronous>, transform_indices = @transform_5, window_bounds = array<i64: 2, 2, 128>}, {pipeline_mode = #tpu.pipeline_mode<synchronous>, transform_indices = @transform_6, window_bounds = array<i64: 4, 128>}, {pipeline_mode = #tpu.pipeline_mode<synchronous>, transform_indices = @transform_7, window_bounds = array<i64: 1, 128>}, {pipeline_mode = #tpu.pipeline_mode<synchronous>, transform_indices = @transform_8, window_bounds = array<i64: 1, 128>}]} {
    %c0 = arith.constant 0 : index
    %c0_0 = arith.constant 0 : index
    %0 = vector.load %arg1[%c0, %c0_0] : memref<128x128xbf16, #tpu.memory_space<vmem>>, vector<128x128xbf16>
    %c0_1 = arith.constant 0 : index
    %c0_2 = arith.constant 0 : index
    %1 = vector.load %arg2[%c0_1, %c0_2] : memref<128x128xbf16, #tpu.memory_space<vmem>>, vector<128x128xbf16>
    %cst = arith.constant dense<0.000000e+00> : vector<128x128xf32>
    %2 = tpu.matmul %0, %1, %cst {dimension_numbers = #tpu.dot_dimension_numbers<[1], [0], [0], [1], [0, 0, 1, 1], [], []>} : vector<128x128xbf16>, vector<128x128xbf16>, vector<128x128xf32> -> vector<128x128xf32>
    %c0_3 = arith.constant 0 : index
    %c0_4 = arith.constant 0 : index
    %3 = vector.load %arg3[%c0_3, %c0_4] : memref<1x128xf32, #tpu.memory_space<vmem>>, vector<1x128xf32>
    %4 = vector.broadcast %3 : vector<1x128xf32> to vector<128x128xf32>
    %5 = arith.addf %2, %4 : vector<128x128xf32>
    %6 = tpu.iota {dimensions = array<i32: 1>} : vector<1x128xi32>
    %c32_i32 = arith.constant 32 : i32
    %7 = vector.broadcast %c32_i32 : i32 to vector<1x128xi32>
    %8 = arith.cmpi eq, %6, %7 : vector<1x128xi32>
    %c0_5 = arith.constant 0 : index
    %c0_6 = arith.constant 0 : index
    %c0_7 = arith.constant 0 : index
    %9 = vector.load %arg4[%c0_5, %c0_6, %c0_7] : memref<2x128x128xbf16, #tpu.memory_space<vmem>>, vector<2x128x128xbf16>
    %c0_8 = arith.constant 0 : index
    %c0_9 = arith.constant 0 : index
    %c0_10 = arith.constant 0 : index
    %10 = vector.load %arg5[%c0_8, %c0_9, %c0_10] : memref<2x384x128xbf16, #tpu.memory_space<vmem>>, vector<2x384x128xbf16>
    %c0_11 = arith.constant 0 : index
    %c0_12 = arith.constant 0 : index
    %c0_13 = arith.constant 0 : index
    %11 = vector.load %arg6[%c0_11, %c0_12, %c0_13] : memref<2x2x128xf32, #tpu.memory_space<vmem>>, vector<2x2x128xf32>
    %12 = vector.extract_strided_slice %9 {offsets = [0, 0, 0], sizes = [1, 128, 128], strides = [1, 1, 1]} : vector<2x128x128xbf16> to vector<1x128x128xbf16>
    %13 = vector.shape_cast %12 : vector<1x128x128xbf16> to vector<128x128xbf16>
    %14 = vector.extract_strided_slice %10 {offsets = [0, 0, 0], sizes = [1, 128, 128], strides = [1, 1, 1]} : vector<2x384x128xbf16> to vector<1x128x128xbf16>
    %15 = vector.shape_cast %14 : vector<1x128x128xbf16> to vector<128x128xbf16>
    %16 = vector.extract_strided_slice %10 {offsets = [0, 128, 0], sizes = [1, 256, 128], strides = [1, 1, 1]} : vector<2x384x128xbf16> to vector<1x256x128xbf16>
    %17 = vector.shape_cast %16 : vector<1x256x128xbf16> to vector<256x128xbf16>
    %18 = vector.extract_strided_slice %11 {offsets = [0, 0, 0], sizes = [1, 1, 128], strides = [1, 1, 1]} : vector<2x2x128xf32> to vector<1x1x128xf32>
    %19 = vector.shape_cast %18 : vector<1x1x128xf32> to vector<1x128xf32>
    %20 = vector.extract_strided_slice %11 {offsets = [0, 1, 0], sizes = [1, 1, 128], strides = [1, 1, 1]} : vector<2x2x128xf32> to vector<1x1x128xf32>
    %21 = vector.shape_cast %20 : vector<1x1x128xf32> to vector<1x128xf32>
    %22 = arith.truncf %5 : vector<128x128xf32> to vector<128x128xbf16>
    %cst_14 = arith.constant dense<0.000000e+00> : vector<128x128xf32>
    %23 = tpu.matmul %22, %15, %cst_14 {dimension_numbers = #tpu.dot_dimension_numbers<[1], [0], [0], [1], [0, 0, 1, 1], [], []>} : vector<128x128xbf16>, vector<128x128xbf16>, vector<128x128xf32> -> vector<128x128xf32>
    %24 = vector.broadcast %19 : vector<1x128xf32> to vector<128x128xf32>
    %25 = arith.addf %23, %24 : vector<128x128xf32>
    %cst_15 = arith.constant 0.000000e+00 : f32
    %26 = vector.broadcast %cst_15 : f32 to vector<128x128xf32>
    %27 = arith.maximumf %25, %26 : vector<128x128xf32>
    %28 = arith.truncf %27 : vector<128x128xf32> to vector<128x128xbf16>
    %cst_16 = arith.constant dense<0.000000e+00> : vector<128x128xf32>
    %29 = tpu.matmul %13, %28, %cst_16 {dimension_numbers = #tpu.dot_dimension_numbers<[1], [0], [0], [1], [0, 0, 1, 1], [], []>} : vector<128x128xbf16>, vector<128x128xbf16>, vector<128x128xf32> -> vector<128x128xf32>
    %cst_17 = arith.constant 0.000000e+00 : f32
    %30 = vector.shape_cast %8 : vector<1x128xi1> to vector<1x128xi1>
    %31 = vector.broadcast %30 : vector<1x128xi1> to vector<128x128xi1>
    %32 = vector.broadcast %cst_17 : f32 to vector<128x128xf32>
    %33 = arith.select %31, %29, %32 : vector<128x128xi1>, vector<128x128xf32>
    %cst_18 = arith.constant dense<0.000000e+00> : vector<128xf32>
    %34 = vector.multi_reduction <add>, %33, %cst_18 [1] : vector<128x128xf32> to vector<128xf32>
    %35 = vector.shape_cast %34 : vector<128xf32> to vector<128x1xf32>
    %cst_19 = arith.constant 1.000000e+00 : f32
    %36 = vector.broadcast %cst_19 : f32 to vector<128x1xf32>
    %37 = arith.maximumf %35, %36 : vector<128x1xf32>
    %38 = tpu.reciprocal %37 {approx = true} : vector<128x1xf32> -> vector<128x1xf32>
    %39 = vector.broadcast %38 : vector<128x1xf32> to vector<128x128xf32>
    %40 = arith.mulf %29, %39 : vector<128x128xf32>
    %41 = arith.truncf %40 : vector<128x128xf32> to vector<128x128xbf16>
    %42 = arith.truncf %5 : vector<128x128xf32> to vector<128x128xbf16>
    %43 = tpu.concatenate %41, %42 in 1 : vector<128x128xbf16>, vector<128x128xbf16> -> vector<128x256xbf16>
    %cst_20 = arith.constant dense<0.000000e+00> : vector<128x128xf32>
    %44 = tpu.matmul %43, %17, %cst_20 {dimension_numbers = #tpu.dot_dimension_numbers<[1], [0], [0], [1], [0, 0, 1, 1], [], []>} : vector<128x256xbf16>, vector<256x128xbf16>, vector<128x128xf32> -> vector<128x128xf32>
    %45 = vector.broadcast %21 : vector<1x128xf32> to vector<128x128xf32>
    %46 = arith.addf %44, %45 : vector<128x128xf32>
    %cst_21 = arith.constant 0.000000e+00 : f32
    %47 = vector.broadcast %cst_21 : f32 to vector<128x128xf32>
    %48 = arith.maximumf %46, %47 : vector<128x128xf32>
    %49 = arith.mulf %48, %48 : vector<128x128xf32>
    %cst_22 = arith.constant dense<0.000000e+00> : vector<128xf32>
    %50 = vector.multi_reduction <add>, %49, %cst_22 [1] : vector<128x128xf32> to vector<128xf32>
    %51 = vector.shape_cast %50 : vector<128xf32> to vector<128x1xf32>
    %cst_23 = arith.constant 0.000000e+00 : f32
    %52 = vector.broadcast %cst_23 : f32 to vector<128x1xf32>
    %53 = arith.cmpf oeq, %51, %52 : vector<128x1xf32>
    %54 = math.rsqrt %51 : vector<128x1xf32>
    %cst_24 = arith.constant 1.000000e+00 : f32
    %55 = vector.broadcast %cst_24 : f32 to vector<128x1xf32>
    %56 = arith.select %53, %55, %54 : vector<128x1xi1>, vector<128x1xf32>
    %57 = vector.broadcast %56 : vector<128x1xf32> to vector<128x128xf32>
    %58 = arith.mulf %48, %57 : vector<128x128xf32>
    %59 = vector.extract_strided_slice %9 {offsets = [1, 0, 0], sizes = [1, 128, 128], strides = [1, 1, 1]} : vector<2x128x128xbf16> to vector<1x128x128xbf16>
    %60 = vector.shape_cast %59 : vector<1x128x128xbf16> to vector<128x128xbf16>
    %61 = vector.extract_strided_slice %10 {offsets = [1, 0, 0], sizes = [1, 128, 128], strides = [1, 1, 1]} : vector<2x384x128xbf16> to vector<1x128x128xbf16>
    %62 = vector.shape_cast %61 : vector<1x128x128xbf16> to vector<128x128xbf16>
    %63 = vector.extract_strided_slice %10 {offsets = [1, 128, 0], sizes = [1, 256, 128], strides = [1, 1, 1]} : vector<2x384x128xbf16> to vector<1x256x128xbf16>
    %64 = vector.shape_cast %63 : vector<1x256x128xbf16> to vector<256x128xbf16>
    %65 = vector.extract_strided_slice %11 {offsets = [1, 0, 0], sizes = [1, 1, 128], strides = [1, 1, 1]} : vector<2x2x128xf32> to vector<1x1x128xf32>
    %66 = vector.shape_cast %65 : vector<1x1x128xf32> to vector<1x128xf32>
    %67 = vector.extract_strided_slice %11 {offsets = [1, 1, 0], sizes = [1, 1, 128], strides = [1, 1, 1]} : vector<2x2x128xf32> to vector<1x1x128xf32>
    %68 = vector.shape_cast %67 : vector<1x1x128xf32> to vector<1x128xf32>
    %69 = arith.truncf %58 : vector<128x128xf32> to vector<128x128xbf16>
    %cst_25 = arith.constant dense<0.000000e+00> : vector<128x128xf32>
    %70 = tpu.matmul %69, %62, %cst_25 {dimension_numbers = #tpu.dot_dimension_numbers<[1], [0], [0], [1], [0, 0, 1, 1], [], []>} : vector<128x128xbf16>, vector<128x128xbf16>, vector<128x128xf32> -> vector<128x128xf32>
    %71 = vector.broadcast %66 : vector<1x128xf32> to vector<128x128xf32>
    %72 = arith.addf %70, %71 : vector<128x128xf32>
    %cst_26 = arith.constant 0.000000e+00 : f32
    %73 = vector.broadcast %cst_26 : f32 to vector<128x128xf32>
    %74 = arith.maximumf %72, %73 : vector<128x128xf32>
    %75 = arith.truncf %74 : vector<128x128xf32> to vector<128x128xbf16>
    %cst_27 = arith.constant dense<0.000000e+00> : vector<128x128xf32>
    %76 = tpu.matmul %60, %75, %cst_27 {dimension_numbers = #tpu.dot_dimension_numbers<[1], [0], [0], [1], [0, 0, 1, 1], [], []>} : vector<128x128xbf16>, vector<128x128xbf16>, vector<128x128xf32> -> vector<128x128xf32>
    %cst_28 = arith.constant 0.000000e+00 : f32
    %77 = vector.shape_cast %8 : vector<1x128xi1> to vector<1x128xi1>
    %78 = vector.broadcast %77 : vector<1x128xi1> to vector<128x128xi1>
    %79 = vector.broadcast %cst_28 : f32 to vector<128x128xf32>
    %80 = arith.select %78, %76, %79 : vector<128x128xi1>, vector<128x128xf32>
    %cst_29 = arith.constant dense<0.000000e+00> : vector<128xf32>
    %81 = vector.multi_reduction <add>, %80, %cst_29 [1] : vector<128x128xf32> to vector<128xf32>
    %82 = vector.shape_cast %81 : vector<128xf32> to vector<128x1xf32>
    %cst_30 = arith.constant 1.000000e+00 : f32
    %83 = vector.broadcast %cst_30 : f32 to vector<128x1xf32>
    %84 = arith.maximumf %82, %83 : vector<128x1xf32>
    %85 = tpu.reciprocal %84 {approx = true} : vector<128x1xf32> -> vector<128x1xf32>
    %86 = vector.broadcast %85 : vector<128x1xf32> to vector<128x128xf32>
    %87 = arith.mulf %76, %86 : vector<128x128xf32>
    %88 = arith.truncf %87 : vector<128x128xf32> to vector<128x128xbf16>
    %89 = arith.truncf %58 : vector<128x128xf32> to vector<128x128xbf16>
    %90 = tpu.concatenate %88, %89 in 1 : vector<128x128xbf16>, vector<128x128xbf16> -> vector<128x256xbf16>
    %cst_31 = arith.constant dense<0.000000e+00> : vector<128x128xf32>
    %91 = tpu.matmul %90, %64, %cst_31 {dimension_numbers = #tpu.dot_dimension_numbers<[1], [0], [0], [1], [0, 0, 1, 1], [], []>} : vector<128x256xbf16>, vector<256x128xbf16>, vector<128x128xf32> -> vector<128x128xf32>
    %92 = vector.broadcast %68 : vector<1x128xf32> to vector<128x128xf32>
    %93 = arith.addf %91, %92 : vector<128x128xf32>
    %cst_32 = arith.constant 0.000000e+00 : f32
    %94 = vector.broadcast %cst_32 : f32 to vector<128x128xf32>
    %95 = arith.maximumf %93, %94 : vector<128x128xf32>
    %96 = arith.mulf %95, %95 : vector<128x128xf32>
    %cst_33 = arith.constant dense<0.000000e+00> : vector<128xf32>
    %97 = vector.multi_reduction <add>, %96, %cst_33 [1] : vector<128x128xf32> to vector<128xf32>
    %98 = vector.shape_cast %97 : vector<128xf32> to vector<128x1xf32>
    %cst_34 = arith.constant 0.000000e+00 : f32
    %99 = vector.broadcast %cst_34 : f32 to vector<128x1xf32>
    %100 = arith.cmpf oeq, %98, %99 : vector<128x1xf32>
    %101 = math.rsqrt %98 : vector<128x1xf32>
    %cst_35 = arith.constant 1.000000e+00 : f32
    %102 = vector.broadcast %cst_35 : f32 to vector<128x1xf32>
    %103 = arith.select %100, %102, %101 : vector<128x1xi1>, vector<128x1xf32>
    %104 = vector.broadcast %103 : vector<128x1xf32> to vector<128x128xf32>
    %105 = arith.mulf %95, %104 : vector<128x128xf32>
    %106 = vector.extract_strided_slice %5 {offsets = [0, 0], sizes = [16, 128], strides = [1, 1]} : vector<128x128xf32> to vector<16x128xf32>
    %107 = vector.extract_strided_slice %105 {offsets = [0, 0], sizes = [16, 128], strides = [1, 1]} : vector<128x128xf32> to vector<16x128xf32>
    %108 = arith.addf %106, %107 : vector<16x128xf32>
    %109 = arith.truncf %108 : vector<16x128xf32> to vector<16x128xbf16>
    "tpu.trace_start"() <{level = 10 : i32, message = "sd,td->st"}> : () -> ()
    %cst_36 = arith.constant dense<0.000000e+00> : vector<16x16xf32>
    %110 = tpu.matmul %109, %109, %cst_36 {dimension_numbers = #tpu.dot_dimension_numbers<[1], [1], [0], [0], [0, 0, 1, 0], [], []>} : vector<16x128xbf16>, vector<16x128xbf16>, vector<16x16xf32> -> vector<16x16xf32>
    "tpu.trace_stop"() : () -> ()
    %111 = arith.truncf %110 : vector<16x16xf32> to vector<16x16xbf16>
    %c0_37 = arith.constant 0 : index
    %c0_38 = arith.constant 0 : index
    %112 = vector.load %arg7[%c0_37, %c0_38] : memref<4x128xi32, #tpu.memory_space<vmem>>, vector<4x128xi32>
    %113 = tpu.iota {dimensions = array<i32: 0>} : vector<16x128xi32>
    %114 = vector.extract_strided_slice %112 {offsets = [0, 0], sizes = [1, 128], strides = [1, 1]} : vector<4x128xi32> to vector<1x128xi32>
    %115 = vector.extract_strided_slice %112 {offsets = [1, 0], sizes = [1, 128], strides = [1, 1]} : vector<4x128xi32> to vector<1x128xi32>
    %116 = vector.broadcast %115 : vector<1x128xi32> to vector<16x128xi32>
    %117 = arith.cmpi eq, %113, %116 : vector<16x128xi32>
    %118 = arith.extui %117 : vector<16x128xi1> to vector<16x128xi32>
    %119 = arith.sitofp %118 : vector<16x128xi32> to vector<16x128xf32>
    %120 = arith.truncf %119 : vector<16x128xf32> to vector<16x128xbf16>
    %121 = vector.broadcast %114 : vector<1x128xi32> to vector<16x128xi32>
    %122 = arith.cmpi eq, %113, %121 : vector<16x128xi32>
    %123 = arith.extui %122 : vector<16x128xi1> to vector<16x128xi32>
    %124 = arith.sitofp %123 : vector<16x128xi32> to vector<16x128xf32>
    %cst_39 = arith.constant dense<0.000000e+00> : vector<16x128xf32>
    %125 = tpu.matmul %111, %120, %cst_39 {dimension_numbers = #tpu.dot_dimension_numbers<[1], [0], [0], [1], [0, 0, 1, 1], [], []>} : vector<16x16xbf16>, vector<16x128xbf16>, vector<16x128xf32> -> vector<16x128xf32>
    %126 = arith.mulf %124, %125 : vector<16x128xf32>
    %cst_40 = arith.constant dense<0.000000e+00> : vector<128xf32>
    %127 = vector.multi_reduction <add>, %126, %cst_40 [0] : vector<16x128xf32> to vector<128xf32>
    %128 = vector.shape_cast %127 : vector<128xf32> to vector<1x128xf32>
    %129 = vector.extract_strided_slice %112 {offsets = [2, 0], sizes = [1, 128], strides = [1, 1]} : vector<4x128xi32> to vector<1x128xi32>
    %130 = vector.extract_strided_slice %112 {offsets = [3, 0], sizes = [1, 128], strides = [1, 1]} : vector<4x128xi32> to vector<1x128xi32>
    %131 = vector.broadcast %130 : vector<1x128xi32> to vector<16x128xi32>
    %132 = arith.cmpi eq, %113, %131 : vector<16x128xi32>
    %133 = arith.extui %132 : vector<16x128xi1> to vector<16x128xi32>
    %134 = arith.sitofp %133 : vector<16x128xi32> to vector<16x128xf32>
    %135 = arith.truncf %134 : vector<16x128xf32> to vector<16x128xbf16>
    %136 = vector.broadcast %129 : vector<1x128xi32> to vector<16x128xi32>
    %137 = arith.cmpi eq, %113, %136 : vector<16x128xi32>
    %138 = arith.extui %137 : vector<16x128xi1> to vector<16x128xi32>
    %139 = arith.sitofp %138 : vector<16x128xi32> to vector<16x128xf32>
    %cst_41 = arith.constant dense<0.000000e+00> : vector<16x128xf32>
    %140 = tpu.matmul %111, %135, %cst_41 {dimension_numbers = #tpu.dot_dimension_numbers<[1], [0], [0], [1], [0, 0, 1, 1], [], []>} : vector<16x16xbf16>, vector<16x128xbf16>, vector<16x128xf32> -> vector<16x128xf32>
    %141 = arith.mulf %139, %140 : vector<16x128xf32>
    %cst_42 = arith.constant dense<0.000000e+00> : vector<128xf32>
    %142 = vector.multi_reduction <add>, %141, %cst_42 [0] : vector<16x128xf32> to vector<128xf32>
    %143 = vector.shape_cast %142 : vector<128xf32> to vector<1x128xf32>
    %144 = arith.subf %143, %128 : vector<1x128xf32>
    %c0_43 = arith.constant 0 : index
    %c0_44 = arith.constant 0 : index
    %145 = vector.load %arg8[%c0_43, %c0_44] : memref<1x128xf32, #tpu.memory_space<vmem>>, vector<1x128xf32>
    %146 = arith.addf %144, %145 : vector<1x128xf32>
    %cst_45 = arith.constant 1.000000e+00 : f32
    %147 = vector.broadcast %cst_45 : f32 to vector<1x128xf32>
    %148 = arith.addf %146, %147 : vector<1x128xf32>
    %cst_46 = arith.constant 0.000000e+00 : f32
    %149 = vector.broadcast %cst_46 : f32 to vector<1x128xf32>
    %150 = arith.maximumf %148, %149 : vector<1x128xf32>
    %151 = tpu.iota {dimensions = array<i32: 1>} : vector<1x128xi32>
    %c16_i32 = arith.constant 16 : i32
    %152 = vector.broadcast %c16_i32 : i32 to vector<1x128xi32>
    %153 = arith.cmpi slt, %151, %152 : vector<1x128xi32>
    %cst_47 = arith.constant 0.000000e+00 : f32
    %154 = vector.broadcast %cst_47 : f32 to vector<1x128xf32>
    %155 = arith.select %153, %150, %154 : vector<1x128xi1>, vector<1x128xf32>
    %c0_48 = arith.constant 0 : index
    %c0_49 = arith.constant 0 : index
    %156 = vector.load %arg9[%c0_48, %c0_49] : memref<1x128xf32, #tpu.memory_space<vmem>>, vector<1x128xf32>
    tpu.vector_store %arg9[%c0_48, %c0_49], %155 {strides = array<i32>} : memref<1x128xf32, #tpu.memory_space<vmem>>, vector<1x128xf32>,
    return
  }
  func.func @transform_0(%arg0: i32) -> (i32, i32) {
    %c0_i32 = arith.constant 0 : i32
    %c0_i32_0 = arith.constant 0 : i32
    %c0_i32_1 = arith.constant 0 : i32
    return %c0_i32, %c0_i32_0 : i32, i32
  }
  func.func @transform_1(%arg0: i32) -> (i32, i32) {
    %c0_i32 = arith.constant 0 : i32
    %c0_i32_0 = arith.constant 0 : i32
    %c0_i32_1 = arith.constant 0 : i32
    return %c0_i32, %c0_i32_0 : i32, i32
  }
  func.func @transform_2(%arg0: i32) -> (i32, i32) {
    %c0_i32 = arith.constant 0 : i32
    %c0_i32_0 = arith.constant 0 : i32
    %c0_i32_1 = arith.constant 0 : i32
    return %c0_i32, %c0_i32_0 : i32, i32
  }
  func.func @transform_3(%arg0: i32) -> (i32, i32, i32) {
    %c0_i32 = arith.constant 0 : i32
    %c0_i32_0 = arith.constant 0 : i32
    %c0_i32_1 = arith.constant 0 : i32
    %c0_i32_2 = arith.constant 0 : i32
    return %c0_i32, %c0_i32_0, %c0_i32_1 : i32, i32, i32
  }
  func.func @transform_4(%arg0: i32) -> (i32, i32, i32) {
    %c0_i32 = arith.constant 0 : i32
    %c0_i32_0 = arith.constant 0 : i32
    %c0_i32_1 = arith.constant 0 : i32
    %c0_i32_2 = arith.constant 0 : i32
    return %c0_i32, %c0_i32_0, %c0_i32_1 : i32, i32, i32
  }
  func.func @transform_5(%arg0: i32) -> (i32, i32, i32) {
    %c0_i32 = arith.constant 0 : i32
    %c0_i32_0 = arith.constant 0 : i32
    %c0_i32_1 = arith.constant 0 : i32
    %c0_i32_2 = arith.constant 0 : i32
    return %c0_i32, %c0_i32_0, %c0_i32_1 : i32, i32, i32
  }
  func.func @transform_6(%arg0: i32) -> (i32, i32) {
    %c0_i32 = arith.constant 0 : i32
    %c0_i32_0 = arith.constant 0 : i32
    %c0_i32_1 = arith.constant 0 : i32
    return %c0_i32, %c0_i32_0 : i32, i32
  }
  func.func @transform_7(%arg0: i32) -> (i32, i32) {
    %c0_i32 = arith.constant 0 : i32
    %c0_i32_0 = arith.constant 0 : i32
    %c0_i32_1 = arith.constant 0 : i32
    return %c0_i32, %c0_i32_0 : i32, i32
  }
  func.func @transform_8(%arg0: i32) -> (i32, i32) {
    %c0_i32 = arith.constant 0 : i32
    %c0_i32_0 = arith.constant 0 : i32
    %c0_i32_1 = arith.constant 0 : i32
    return %c0_i32, %c0_i32_0 : i32, i32
  }
}

</mosaic_0001>

<bundles_post_ra>
// kernel: tpu_custom_call.1
= control target key start
LH: loop header
LB: loop body
LE: loop exit
PB: predicated region body
PF: predicated region fallthrough
CT: control target
= control target key end

     0   :  { %13 = vsyncpa [#allocation3], 0  ;;  %s3413_s0 = inlined_call_operand.hbm [shape: bf16[128,128], index: 0, kind: input, shape index: {}]   ;;  %s3414_s1 = inlined_call_operand.hbm [shape: bf16[128,128], index: 1, kind: input, shape index: {}]   ;;  %s3415_s2 = inlined_call_operand.vmem [shape: f32[1,128], index: 2, kind: input, shape index: {}]   ;;  %s3416_s3 = inlined_call_operand.hbm [shape: bf16[2,128,128], index: 3, kind: input, shape index: {}]   ;;  %s3417_s4 = inlined_call_operand.hbm [shape: bf16[2,384,128], index: 4, kind: input, shape index: {}]   ;;  %s3418_s5 = inlined_call_operand.vmem [shape: f32[2,2,128], index: 5, kind: input, shape index: {}]   ;;  %s3419_s6 = inlined_call_operand.vmem [shape: s32[4,128], index: 6, kind: input, shape index: {}]   ;;  %s3420_s7 = inlined_call_operand.vmem [shape: f32[1,128], index: 7, kind: input, shape index: {}]   ;;  %s3421_s8 = inlined_call_operand.hbm [shape: f32[1,128], index: 8, kind: output, shape index: {}]  }
   0x1   :  { %14 = vsyncpa [#allocation6], 0 }
   0x2   :  { %15 = vsyncpa [#allocation9], 0 }
   0x3   :  { %16 = vsyncpa [#allocation4], 0  ;;  %s2852_s27 = smov [#allocation5]   ;;  %s2853_s29 = smov [#allocation2]  }
   0x4   :  { %s34_s28 = sshll.u32 %s2852_s27, 4  ;;  %s22_s30 = sshll.u32 %s2853_s29, 4  ;;  %s35_s28 = int_to_ptr.vmem [resolvable:$true] %s34_s28  ;;  %s2907_s30 = int_to_ptr.vmem [resolvable:$true] %s22_s30 }
   0x5   :  { %s2734_s11 = scalar_lea.hbm %s3414_s1, 1024 }
   0x6   :  { %p2735_p0 = scmp.ne.s32.totalorder %s3414_s1, %s2734_s11  ;;  %p2738_p1 = scmp.lt.u32.totalorder %s2734_s11, %s3414_s1 }
   0x8   :  { %p2740_p2 = pnand %p2738_p1, %p2735_p0 }
   0xa   :  { %2743 = shalt.err (!%p2740_p2)
}
   0xb   :  { %s2744_s16 = scalar_lea.vmem %s35_s28, 1024  ;;  %p2749_p4 = scmp.lt.s32.totalorder %s35_s28, %s35_s28 }
   0xc   :  { %p2745_p3 = scmp.ne.s32.totalorder %s35_s28, %s2744_s16  ;;  %p2750_p5 = scmp.lt.s32.totalorder %s2744_s16, %s2744_s16 }
   0xe   :  { %p2751_p6 = por %p2750_p5, %p2749_p4 }
  0x10   :  { %p2752_p7 = pnand %p2751_p6, %p2745_p3 }
  0x12   :  { %2755 = shalt.err (!%p2752_p7)
}
  0x13   :  { %s2854_s17 = smov 64   ;;  %s2855_s18 = smov 4  }
  0x14   :  { %40 = dma.hbm_to_vmem [thread:$0]  %s3414_s1, 1024, %s35_s28, [#allocation6], %s2854_s17, %s2854_s17, %s2855_s18  }
  0x15   :  { %s2756_s23 = scalar_lea.hbm %s3413_s0, 1024 }
  0x16   :  { %p2757_p8 = scmp.ne.s32.totalorder %s3413_s0, %s2756_s23  ;;  %p2760_p9 = scmp.lt.u32.totalorder %s2756_s23, %s3413_s0 }
  0x18   :  { %p2762_p10 = pnand %p2760_p9, %p2757_p8 }
  0x1a   :  { %2765 = shalt.err (!%p2762_p10)
}
  0x1b   :  { %s2766_s29 = scalar_lea.vmem %s2907_s30, 1024  ;;  %p2771_p12 = scmp.lt.s32.totalorder %s2907_s30, %s2907_s30 }
  0x1c   :  { %p2767_p11 = scmp.ne.s32.totalorder %s2907_s30, %s2766_s29  ;;  %p2772_p13 = scmp.lt.s32.totalorder %s2766_s29, %s2766_s29 }
  0x1e   :  { %p2773_p0 = por %p2772_p13, %p2771_p12 }
  0x20   :  { %p2774_p1 = pnand %p2773_p0, %p2767_p11 }
  0x22   :  { %2777 = shalt.err (!%p2774_p1)
}
  0x23   :  { %28 = dma.hbm_to_vmem [thread:$0]  %s3413_s0, 1024, %s2907_s30, [#allocation3], %s2854_s17, %s2854_s17, %s2855_s18  }
  0x24   :  { %s2856_s9 = smov [#allocation7]   ;;  %s2857_s11 = smov [#allocation8]  }
  0x25   :  { %s48_s10 = sshll.u32 %s2856_s9, 4  ;;  %s60_s12 = sshll.u32 %s2857_s11, 4  ;;  %s49_s10 = int_to_ptr.vmem [resolvable:$true] %s48_s10  ;;  %s2944_s12 = int_to_ptr.vmem [resolvable:$true] %s60_s12 }
  0x26   :  { %s2778_s15 = scalar_lea.hbm %s3416_s3, 2048 }
  0x27   :  { %p2779_p2 = scmp.ne.s32.totalorder %s3416_s3, %s2778_s15  ;;  %p2782_p3 = scmp.lt.u32.totalorder %s2778_s15, %s3416_s3 }
  0x29   :  { %p2784_p4 = pnand %p2782_p3, %p2779_p2 }
  0x2b   :  { %2787 = shalt.err (!%p2784_p4)
}
  0x2c   :  { %s2788_s0 = scalar_lea.vmem %s49_s10, 2048  ;;  %p2793_p6 = scmp.lt.s32.totalorder %s49_s10, %s49_s10 }
  0x2d   :  { %p2789_p5 = scmp.ne.s32.totalorder %s49_s10, %s2788_s0  ;;  %p2794_p7 = scmp.lt.s32.totalorder %s2788_s0, %s2788_s0 }
  0x2f   :  { %p2795_p8 = por %p2794_p7, %p2793_p6 }
  0x31   :  { %p2796_p9 = pnand %p2795_p8, %p2789_p5 }
  0x33   :  { %2799 = shalt.err (!%p2796_p9)
}
  0x34   :  { %54 = dma.hbm_to_vmem [thread:$0]  %s3416_s3, 2048, %s49_s10, [#allocation6], %s2854_s17, %s2854_s17, %s2855_s18  }
  0x35   :  { %s2800_s25 = scalar_lea.hbm %s3417_s4, 6144 }
  0x36   :  { %p2801_p10 = scmp.ne.s32.totalorder %s3417_s4, %s2800_s25  ;;  %p2804_p11 = scmp.lt.u32.totalorder %s2800_s25, %s3417_s4 }
  0x38   :  { %p2806_p12 = pnand %p2804_p11, %p2801_p10 }
  0x3a   :  { %2809 = shalt.err (!%p2806_p12)
}
  0x3b   :  { %s2810_s28 = scalar_lea.vmem %s2944_s12, 6144  ;;  %p2815_p0 = scmp.lt.s32.totalorder %s2944_s12, %s2944_s12 }
  0x3c   :  { %p2811_p13 = scmp.ne.s32.totalorder %s2944_s12, %s2810_s28  ;;  %p2816_p1 = scmp.lt.s32.totalorder %s2810_s28, %s2810_s28 }
  0x3e   :  { %p2817_p2 = por %p2816_p1, %p2815_p0 }
  0x40   :  { %p2818_p3 = pnand %p2817_p2, %p2811_p13 }
  0x42   :  { %2821 = shalt.err (!%p2818_p3)
}
  0x43   :  { %66 = dma.hbm_to_vmem [thread:$0]  %s3417_s4, 6144, %s2944_s12, [#allocation9], %s2854_s17, %s2854_s17, %s2855_s18  }
  0x44   :  { %2844 = dma.done.wait [#allocation3], 1024  }
  0x45   :  { %2845 = vsyncadd [#allocation3], 4294966272 }
  0x46   :  { %2846 = dma.done.wait [#allocation6], 3072  }
  0x47   :  { %2847 = vsyncadd [#allocation6], 4294964224 }
  0x48   :  { %2848 = dma.done.wait [#allocation9], 6144  }
  0x49   :  { %2849 = vsyncadd [#allocation9], 4294961152  ;;  %v2554_v0 = vld [vmem:[#allocation5] sm:$0xff]   ;;  %v2555_v1 = vld [vmem:[#allocation5 + $0x8] sm:$0xff]   ;;  %s2861_s14 = smov [#allocation10]  }
  0x4a   :  { %2366 = vmatprep.subr.bf16.mxu0 %v2554_v0  ;;  %v2556_v2 = vld [vmem:[#allocation5 + $0x10] sm:$0xff]   ;;  %v2557_v3 = vld [vmem:[#allocation5 + $0x18] sm:$0xff]   ;;  %v2562_v4 = vld [vmem:[#allocation2] sm:$0xff]   ;;  %s2046_s15 = sshll.u32 %s2861_s14, 4  ;;  %s2047_s15 = int_to_ptr.vmem [resolvable:$true] %s2046_s15 }
  0x4b   :  { %2367 = vmatpush3.bf16.msra.mxu0 %v2554_v0  ;;  %2382 = vmatprep.mubr.bf16.mxu0 %v2562_v4  ;;  %v2558_v5 = vld [vmem:[#allocation5 + $0x20] sm:$0xff]   ;;  %v2559_v6 = vld [vmem:[#allocation5 + $0x28] sm:$0xff]   ;;  %v2560_v9 = vld [vmem:[#allocation5 + $0x30] sm:$0xff]   ;;  %s2822_s16 = scalar_lea.vmem %s2047_s15, 16  ;;  %s2826_s19 = scalar_lea.vmem %s2047_s15, 32 }
  0x4c   :  { %2368 = vmatprep.subr.bf16.mxu0 %v2555_v1  ;;  %v2570_v7 = vld [vmem:[#allocation8] sm:$0xff]   ;;  %v2571_v8 = vld [vmem:[#allocation8 + $0x8] sm:$0xff]   ;;  %v2572_v10 = vld [vmem:[#allocation8 + $0x10] sm:$0xff]   ;;  %p2823_p4 = scmp.ne.s32.totalorder %s2047_s15, %s2822_s16  ;;  %p2827_p5 = scmp.lt.s32.totalorder %s2047_s15, %s2047_s15 }
  0x4d   :  { %2398 = vmatprep.subr.bf16.mxu1 %v2570_v7  ;;  %v2561_v11 = vld [vmem:[#allocation5 + $0x38] sm:$0xff]   ;;  %v2574_v13 = vld [vmem:[#allocation8 + $0x20] sm:$0xff]   ;;  %v2563_v14 = vld [vmem:[#allocation2 + $0x8] sm:$0xff]   ;;  %p2828_p6 = scmp.lt.s32.totalorder %s2826_s19, %s2822_s16 }
  0x4e   :  { %2399 = vmatpush3.bf16.msra.mxu1 %v2570_v7  ;;  %v2573_v12 = vld [vmem:[#allocation8 + $0x18] sm:$0xff]   ;;  %v2564_v15 = vld [vmem:[#allocation2 + $0x10] sm:$0xff]   ;;  %v2575_v16 = vld [vmem:[#allocation8 + $0x28] sm:$0xff]  }
  0x4f   :  { %2369 = vmatpush3.bf16.msra.mxu0 %v2555_v1  ;;  %2400 = vmatprep.subr.bf16.mxu1 %v2571_v8  ;;  %v2565_v17 = vld [vmem:[#allocation2 + $0x18] sm:$0xff]   ;;  %v2566_v18 = vld [vmem:[#allocation2 + $0x20] sm:$0xff]   ;;  %v2567_v19 = vld [vmem:[#allocation2 + $0x28] sm:$0xff]   ;;  %p2829_p7 = por %p2828_p6, %p2827_p5 }
  0x50   :  { %2370 = vmatprep.subr.bf16.mxu0 %v2556_v2  ;;  %v2568_v20 = vld [vmem:[#allocation2 + $0x30] sm:$0xff]   ;;  %v2569_v21 = vld [vmem:[#allocation2 + $0x38] sm:$0xff]   ;;  %v2057_v25 = vld [vmem:[%s3415_s2] ss:$0 sm:$0xff] }
  0x51   :  { %v2576_v22 = vld [vmem:[#allocation8 + $0x30] sm:$0xff]   ;;  %v2577_v23 = vld [vmem:[#allocation8 + $0x38] sm:$0xff]   ;;  %v2578_v1 = vld [vmem:[#allocation7] sm:$0xff]   ;;  %p2830_p8 = pnand %p2829_p7, %p2823_p4 }
  0x52   :  { %2401 = vmatpush3.bf16.msra.mxu1 %v2571_v8 }
  0x53   :  { %2371 = vmatpush3.bf16.msra.mxu0 %v2556_v2  ;;  %2402 = vmatprep.subr.bf16.mxu1 %v2572_v10  ;;  %v318_v2 = vlaneseq }
  0x54   :  { %2372 = vmatprep.subr.bf16.mxu0 %v2557_v3 }
  0x56   :  { %2403 = vmatpush3.bf16.msra.mxu1 %v2572_v10 }
  0x57   :  { %2373 = vmatpush3.bf16.msra.mxu0 %v2557_v3  ;;  %2404 = vmatprep.subr.bf16.mxu1 %v2573_v12  ;;  %v3012_v3 = vshrl.u32 %v318_v2, 7 }
  0x58   :  { %2374 = vmatprep.subr.bf16.mxu0 %v2558_v5 }
  0x59   :  { %v3015_v4 = vsub.s32 0, %v3012_v3 }
  0x5a   :  { %2405 = vmatpush3.bf16.msra.mxu1 %v2573_v12 }
  0x5b   :  { %2375 = vmatpush3.bf16.msra.mxu0 %v2558_v5  ;;  %2406 = vmatprep.subr.bf16.mxu1 %v2574_v13  ;;  %v3020_v5 = vld [vmem:[%s3418_s5] sm:$0x3] }
  0x5c   :  { %2376 = vmatprep.subr.bf16.mxu0 %v2559_v6 }
  0x5e   :  { %2407 = vmatpush3.bf16.msra.mxu1 %v2574_v13 }
  0x5f   :  { %2377 = vmatpush3.bf16.msra.mxu0 %v2559_v6  ;;  %2408 = vmatprep.subr.bf16.mxu1 %v2575_v16  ;;  %v462_v6 = vrot.slane %v3020_v5, %v3015_v4 }
  0x60   :  { %2378 = vmatprep.subr.bf16.mxu0 %v2560_v9 }
  0x62   :  { %2409 = vmatpush3.bf16.msra.mxu1 %v2575_v16 }
  0x63   :  { %2379 = vmatpush3.bf16.msra.mxu0 %v2560_v9  ;;  %2410 = vmatprep.subr.bf16.mxu1 %v2576_v22 }
  0x64   :  { %2380 = vmatprep.subr.bf16.mxu0 %v2561_v11 }
  0x66   :  { %2411 = vmatpush3.bf16.msra.mxu1 %v2576_v22 }
  0x67   :  { %2381 = vmatpush3.bf16.msra.mxu0 %v2561_v11  ;;  %2412 = vmatprep.subr.bf16.mxu1 %v2577_v23 }
  0x6a   :  { %2383 = vmatmul.mubr.bf16.vlgmr.msra.gmra.mrb[0].mxu0 %v2563_v14  ;;  %2413 = vmatpush3.bf16.msra.mxu1 %v2577_v23 }
  0x6b   :  { %2386 = vmatprep.mubr.bf16.mxu0 %v2564_v15 }
  0x72   :  { %2387 = vmatmul.mubr.bf16.gmra.mrb[4].mxu0 %v2565_v17 }
  0x73   :  { %2390 = vmatprep.mubr.bf16.mxu0 %v2566_v18 }
  0x7a   :  { %2391 = vmatmul.mubr.bf16.gmra.mrb[8].mxu0 %v2567_v19 }
  0x7b   :  { %2394 = vmatprep.mubr.bf16.mxu0 %v2568_v20 }
  0x82   :  { %2395 = vmatmul.mubr.bf16.gmra.mrb[12].mxu0 %v2569_v21 }
  0x83   :  { %2446 = vmatprep.mubr.bf16.mxu0 %v2578_v1 }
 0x13d   :  { %v2384_v24 = vpop.f32.mrb[0].mxu0 }
 0x13e   :  { %v255_v26 = vpop.f32.mrb[1].mxu0  ;;  %v264_v28 = vadd.f32 %v2384_v24, %v2057_v25 }
 0x13f   :  { %v2385_v27 = vpop.f32.mrb[2].mxu0  ;;  %v2984_v31 = vadd.f32 %v2057_v25, %v255_v26 }
 0x140   :  { %v267_v29 = vadd.f32 %v2385_v27, %v2057_v25  ;;  %v258_v30 = vpop.f32.mrb[3].mxu0 }
 0x141   :  { %v2986_v32 = vadd.f32 %v2057_v25, %v258_v30 }
 0x142   :  { %v2988_v33 = vpack.c.bf16 %v267_v29, %v264_v28 }
 0x143   :  { %v451_v34 = vpack.c.bf16 %v2986_v32, %v2984_v31 }
 0x145   :  { %v2388_v35 = vpop.f32.mrb[4].mxu0  ;;  %2414 = vmatprep.mubr.bf16.mxu1 %v451_v34 }
 0x146   :  { %v271_v36 = vpop.f32.mrb[5].mxu0  ;;  %2415 = vmatmul.mubr.bf16.vlgmr.msra.gmra.mrb[0].mxu1 %v2988_v33  ;;  %v280_v38 = vadd.f32 %v2388_v35, %v2057_v25 }
 0x147   :  { %v2389_v37 = vpop.f32.mrb[6].mxu0  ;;  %v272_v41 = vadd.f32 %v2057_v25, %v271_v36 }
 0x148   :  { %v283_v39 = vadd.f32 %v2389_v37, %v2057_v25  ;;  %v274_v40 = vpop.f32.mrb[7].mxu0 }
 0x149   :  { %v275_v42 = vadd.f32 %v2057_v25, %v274_v40 }
 0x14a   :  { %v2993_v43 = vpack.c.bf16 %v283_v39, %v280_v38 }
 0x14b   :  { %v2995_v44 = vpack.c.bf16 %v275_v42, %v272_v41 }
 0x14d   :  { %v2392_v45 = vpop.f32.mrb[8].mxu0  ;;  %2418 = vmatprep.mubr.bf16.mxu1 %v2995_v44 }
 0x14e   :  { %v287_v46 = vpop.f32.mrb[9].mxu0  ;;  %2419 = vmatmul.mubr.bf16.gmra.mrb[4].mxu1 %v2993_v43  ;;  %v296_v48 = vadd.f32 %v2392_v45, %v2057_v25 }
 0x14f   :  { %v2393_v47 = vpop.f32.mrb[10].mxu0  ;;  %v288_v51 = vadd.f32 %v2057_v25, %v287_v46 }
 0x150   :  { %v299_v49 = vadd.f32 %v2393_v47, %v2057_v25  ;;  %v290_v50 = vpop.f32.mrb[11].mxu0 }
 0x151   :  { %v291_v52 = vadd.f32 %v2057_v25, %v290_v50 }
 0x152   :  { %v2999_v53 = vpack.c.bf16 %v299_v49, %v296_v48 }
 0x153   :  { %v3001_v54 = vpack.c.bf16 %v291_v52, %v288_v51 }
 0x155   :  { %v2396_v55 = vpop.f32.mrb[12].mxu0  ;;  %2422 = vmatprep.mubr.bf16.mxu1 %v3001_v54 }
 0x156   :  { %v303_v56 = vpop.f32.mrb[13].mxu0  ;;  %2423 = vmatmul.mubr.bf16.gmra.mrb[8].mxu1 %v2999_v53  ;;  %v312_v58 = vadd.f32 %v2396_v55, %v2057_v25 }
 0x157   :  { %v2397_v57 = vpop.f32.mrb[14].mxu0  ;;  %v304_v61 = vadd.f32 %v2057_v25, %v303_v56 }
 0x158   :  { %v315_v59 = vadd.f32 %v2397_v57, %v2057_v25  ;;  %v306_v60 = vpop.f32.mrb[15].mxu0 }
 0x159   :  { %v307_v62 = vadd.f32 %v2057_v25, %v306_v60 }
 0x15a   :  { %v3005_v63 = vpack.c.bf16 %v315_v59, %v312_v58 }
 0x15b   :  { %v3007_v0 = vpack.c.bf16 %v307_v62, %v304_v61 }
 0x15d   :  { %2426 = vmatprep.mubr.bf16.mxu1 %v3007_v0 }
 0x15e   :  { %2427 = vmatmul.mubr.bf16.gmra.mrb[12].mxu1 %v3005_v63 }
 0x15f   :  { %1015 = vmatprep.mubr.bf16.mxu1 %v451_v34 }
 0x219   :  { %v2416_v7 = vpop.f32.mrb[0].mxu1 }
 0x21a   :  { %v554_v8 = vadd.f32 %v2416_v7, %v462_v6  ;;  %v545_v9 = vpop.f32.mrb[1].mxu1 }
 0x21b   :  { %v546_v10 = vadd.f32 %v545_v9, %v462_v6  ;;  %v2417_v11 = vpop.f32.mrb[2].mxu1 }
 0x21c   :  { %v557_v12 = vadd.f32 %v2417_v11, %v462_v6  ;;  %v548_v13 = vpop.f32.mrb[3].mxu1  ;;  %v610_v15 = vmax.f32 %v554_v8, 0.0 }
 0x21d   :  { %v549_v14 = vadd.f32 %v548_v13, %v462_v6  ;;  %v608_v17 = vmax.f32 %v546_v10, 0.0  ;;  %v2579_v13 = vld [vmem:[#allocation7 + $0x8] sm:$0xff]  }
 0x21e   :  { %v611_v16 = vmax.f32 %v557_v12, 0.0 }
 0x21f   :  { %v609_v18 = vmax.f32 %v549_v14, 0.0  ;;  %v2580_v14 = vld [vmem:[#allocation7 + $0x10] sm:$0xff]  }
 0x220   :  { %v625_v19 = vpack.c.bf16 %v611_v16, %v610_v15  ;;  %v2581_v15 = vld [vmem:[#allocation7 + $0x18] sm:$0xff]   ;;  %v2582_v16 = vld [vmem:[#allocation7 + $0x20] sm:$0xff]  }
 0x221   :  { %v624_v20 = vpack.c.bf16 %v609_v18, %v608_v17  ;;  %v2420_v21 = vpop.f32.mrb[4].mxu1  ;;  %v2584_v17 = vld [vmem:[#allocation7 + $0x30] sm:$0xff]   ;;  %v2585_v18 = vld [vmem:[#allocation7 + $0x38] sm:$0xff]  }
 0x222   :  { %v570_v22 = vadd.f32 %v2420_v21, %v462_v6  ;;  %v561_v23 = vpop.f32.mrb[5].mxu1  ;;  %v2588_v21 = vld [vmem:[#allocation8 + $0x88] sm:$0xff]  }
 0x223   :  { %v562_v24 = vadd.f32 %v561_v23, %v462_v6  ;;  %v2421_v25 = vpop.f32.mrb[6].mxu1  ;;  %2430 = vmatprep.subr.bf16.mxu0 %v624_v20  ;;  %v2590_v23 = vld [vmem:[#allocation8 + $0x90] sm:$0xff]  }
 0x224   :  { %v573_v26 = vadd.f32 %v2421_v25, %v462_v6  ;;  %v564_v27 = vpop.f32.mrb[7].mxu1  ;;  %2431 = vmatpush3.bf16.msra.mxu0 %v624_v20  ;;  %v614_v29 = vmax.f32 %v570_v22, 0.0  ;;  %v2587_v20 = vld [vmem:[#allocation8 + $0x40] sm:$0xff]   ;;  %v2589_v22 = vld [vmem:[#allocation8 + $0x48] sm:$0xff]   ;;  %v3025_v25 = vand.u32 127, %v318_v2 }
 0x225   :  { %v565_v28 = vadd.f32 %v564_v27, %v462_v6  ;;  %2432 = vmatprep.subr.bf16.mxu0 %v625_v19  ;;  %v612_v34 = vmax.f32 %v562_v24, 0.0  ;;  %v2591_v24 = vld [vmem:[#allocation8 + $0x50] sm:$0xff]  }
 0x226   :  { %v615_v30 = vmax.f32 %v573_v26, 0.0  ;;  %vm320_vm0 = vcmp.eq.s32.totalorder %v3025_v25, 32 }
 0x227   :  { %v613_v35 = vmax.f32 %v565_v28, 0.0 }
 0x228   :  { %v627_v36 = vpack.c.bf16 %v615_v30, %v614_v29  ;;  %2433 = vmatpush3.bf16.msra.mxu0 %v625_v19  ;;  %v2586_v19 = vld [vmem:[#allocation8 + $0x80] sm:$0xff]  }
 0x229   :  { %v626_v37 = vpack.c.bf16 %v613_v35, %v612_v34  ;;  %v2424_v38 = vpop.f32.mrb[8].mxu1  ;;  %2200 = vmatprep.subr.bf16.mxu1 %v2586_v19 }
 0x22a   :  { %v586_v39 = vadd.f32 %v2424_v38, %v462_v6  ;;  %v577_v40 = vpop.f32.mrb[9].mxu1  ;;  %2201 = vmatpush3.bf16.msra.mxu1 %v2587_v20 }
 0x22b   :  { %v578_v41 = vadd.f32 %v577_v40, %v462_v6  ;;  %v2425_v42 = vpop.f32.mrb[10].mxu1  ;;  %2434 = vmatprep.subr.bf16.mxu0 %v626_v37  ;;  %2202 = vmatprep.subr.bf16.mxu1 %v2588_v21 }
 0x22c   :  { %v589_v45 = vadd.f32 %v2425_v42, %v462_v6  ;;  %v580_v46 = vpop.f32.mrb[11].mxu1  ;;  %2435 = vmatpush3.bf16.msra.mxu0 %v626_v37  ;;  %v618_v48 = vmax.f32 %v586_v39, 0.0 }
 0x22d   :  { %v581_v47 = vadd.f32 %v580_v46, %v462_v6  ;;  %2436 = vmatprep.subr.bf16.mxu0 %v627_v36  ;;  %v616_v50 = vmax.f32 %v578_v41, 0.0 }
 0x22e   :  { %v619_v49 = vmax.f32 %v589_v45, 0.0  ;;  %2203 = vmatpush3.bf16.msra.mxu1 %v2589_v22 }
 0x22f   :  { %v617_v51 = vmax.f32 %v581_v47, 0.0  ;;  %2204 = vmatprep.subr.bf16.mxu1 %v2590_v23  ;;  %v2592_v47 = vld [vmem:[#allocation8 + $0x98] sm:$0xff]  }
 0x230   :  { %v629_v52 = vpack.c.bf16 %v619_v49, %v618_v48  ;;  %2437 = vmatpush3.bf16.msra.mxu0 %v627_v36  ;;  %v2593_v49 = vld [vmem:[#allocation8 + $0x58] sm:$0xff]  }
 0x231   :  { %v628_v55 = vpack.c.bf16 %v617_v51, %v616_v50  ;;  %v2428_v56 = vpop.f32.mrb[12].mxu1 }
 0x232   :  { %v602_v57 = vadd.f32 %v2428_v56, %v462_v6  ;;  %v593_v58 = vpop.f32.mrb[13].mxu1  ;;  %2205 = vmatpush3.bf16.msra.mxu1 %v2591_v24 }
 0x233   :  { %v594_v59 = vadd.f32 %v593_v58, %v462_v6  ;;  %v2429_v60 = vpop.f32.mrb[14].mxu1  ;;  %2438 = vmatprep.subr.bf16.mxu0 %v628_v55  ;;  %2206 = vmatprep.subr.bf16.mxu1 %v2592_v47  ;;  %v2595_v58 = vld [vmem:[#allocation8 + $0x60] sm:$0xff]  }
 0x234   :  { %v605_v61 = vadd.f32 %v2429_v60, %v462_v6  ;;  %v596_v62 = vpop.f32.mrb[15].mxu1  ;;  %2439 = vmatpush3.bf16.msra.mxu0 %v628_v55  ;;  %v622_v7 = vmax.f32 %v602_v57, 0.0  ;;  %v2594_v57 = vld [vmem:[#allocation8 + $0xa0] sm:$0xff]  }
 0x235   :  { %v597_v1 = vadd.f32 %v596_v62, %v462_v6  ;;  %2440 = vmatprep.subr.bf16.mxu0 %v629_v52  ;;  %v620_v9 = vmax.f32 %v594_v59, 0.0  ;;  %v2583_v6 = vld [vmem:[#allocation7 + $0x28] sm:$0xff]  }
 0x236   :  { %v623_v8 = vmax.f32 %v605_v61, 0.0  ;;  %2207 = vmatpush3.bf16.msra.mxu1 %v2593_v49  ;;  %v2596_v61 = vld [vmem:[#allocation8 + $0xa8] sm:$0xff]  }
 0x237   :  { %v621_v10 = vmax.f32 %v597_v1, 0.0  ;;  %2208 = vmatprep.subr.bf16.mxu1 %v2594_v57  ;;  %v2597_v1 = vld [vmem:[#allocation8 + $0x68] sm:$0xff]  }
 0x238   :  { %v631_v11 = vpack.c.bf16 %v623_v8, %v622_v7  ;;  %2441 = vmatpush3.bf16.msra.mxu0 %v629_v52 }
 0x239   :  { %v630_v12 = vpack.c.bf16 %v621_v10, %v620_v9 }
 0x23a   :  { %2209 = vmatpush3.bf16.msra.mxu1 %v2595_v58 }
 0x23b   :  { %2442 = vmatprep.subr.bf16.mxu0 %v630_v12  ;;  %2210 = vmatprep.subr.bf16.mxu1 %v2596_v61 }
 0x23c   :  { %2443 = vmatpush3.bf16.msra.mxu0 %v630_v12  ;;  %v2598_v12 = vld [vmem:[#allocation8 + $0xb0] sm:$0xff]  }
 0x23d   :  { %2444 = vmatprep.subr.bf16.mxu0 %v631_v11 }
 0x23e   :  { %2211 = vmatpush3.bf16.msra.mxu1 %v2597_v1 }
 0x23f   :  { %2212 = vmatprep.subr.bf16.mxu1 %v2598_v12 }
 0x240   :  { %2445 = vmatpush3.bf16.msra.mxu0 %v631_v11 }
 0x243   :  { %2447 = vmatmul.mubr.bf16.vlgmr.msra.gmra.mrb[16].mxu0 %v2579_v13  ;;  %v2599_v13 = vld [vmem:[#allocation8 + $0x70] sm:$0xff]  }
 0x244   :  { %2450 = vmatprep.mubr.bf16.mxu0 %v2580_v14  ;;  %2213 = vmatpush3.bf16.msra.mxu1 %v2599_v13 }
 0x24b   :  { %2451 = vmatmul.mubr.bf16.gmra.mrb[20].mxu0 %v2581_v15  ;;  %v2600_v15 = vld [vmem:[#allocation8 + $0xb8] sm:$0xff]  }
 0x24c   :  { %2454 = vmatprep.mubr.bf16.mxu0 %v2582_v16  ;;  %v2601_v16 = vld [vmem:[#allocation8 + $0x78] sm:$0xff]   ;;  %2214 = vmatprep.subr.bf16.mxu1 %v2600_v15 }
 0x24d   :  { %2215 = vmatpush3.bf16.msra.mxu1 %v2601_v16 }
 0x253   :  { %2455 = vmatmul.mubr.bf16.gmra.mrb[24].mxu0 %v2583_v6 }
 0x254   :  { %2458 = vmatprep.mubr.bf16.mxu0 %v2584_v17 }
 0x25b   :  { %2459 = vmatmul.mubr.bf16.gmra.mrb[28].mxu0 %v2585_v18 }
 0x316   :  { %v3028_v26 = vpop.f32.mrb[16].mxu0 }
 0x317   :  { %v3030_v27 = vpop.f32.mrb[17].mxu0  ;;  %v781_v28 = vsel %vm320_vm0, %v3028_v26, 0.0 }
 0x318   :  { %799 = vadd.xlane.f32.xlu1 %v781_v28  ;;  %v3035_v29 = vpop.f32.mrb[18].mxu0  ;;  %v779_v30 = vsel %vm320_vm0, %v3030_v27, 0.0 }
 0x319   :  { %795 = vadd.xlane.f32.xlu0 %v779_v30  ;;  %v3040_v2 = vpop.f32.mrb[19].mxu0  ;;  %v782_v34 = vsel %vm320_vm0, %v3035_v29, 0.0 }
 0x31a   :  { %v780_v35 = vsel %vm320_vm0, %v3040_v2, 0.0 }
 0x31c   :  { %801 = vadd.xlane.f32.xlu1 %v782_v34 }
 0x31d   :  { %797 = vadd.xlane.f32.xlu0 %v780_v35 }
 0x31e   :  { %v3048_v36 = vpop.f32.mrb[20].mxu0 }
 0x31f   :  { %v3050_v37 = vpop.f32.mrb[21].mxu0  ;;  %v785_v42 = vsel %vm320_vm0, %v3048_v36, 0.0 }
 0x320   :  { %v3052_v38 = vpop.f32.mrb[22].mxu0  ;;  %v783_v39 = vsel %vm320_vm0, %v3050_v37, 0.0 }
 0x321   :  { %803 = vadd.xlane.f32.xlu0 %v783_v39  ;;  %v3057_v40 = vpop.f32.mrb[23].mxu0  ;;  %v786_v45 = vsel %vm320_vm0, %v3052_v38, 0.0 }
 0x322   :  { %v784_v41 = vsel %vm320_vm0, %v3057_v40, 0.0 }
 0x323   :  { %805 = vadd.xlane.f32.xlu1 %v784_v41 }
 0x325   :  { %807 = vadd.xlane.f32.xlu0 %v785_v42 }
 0x326   :  { %v3068_v46 = vpop.f32.mrb[24].mxu0 }
 0x327   :  { %809 = vadd.xlane.f32.xlu1 %v786_v45  ;;  %v3070_v48 = vpop.f32.mrb[25].mxu0  ;;  %v789_v56 = vsel %vm320_vm0, %v3068_v46, 0.0 }
 0x328   :  { %v3072_v50 = vpop.f32.mrb[26].mxu0  ;;  %v787_v51 = vsel %vm320_vm0, %v3070_v48, 0.0 }
 0x329   :  { %811 = vadd.xlane.f32.xlu0 %v787_v51  ;;  %v3077_v52 = vpop.f32.mrb[27].mxu0  ;;  %v790_v59 = vsel %vm320_vm0, %v3072_v50, 0.0 }
 0x32a   :  { %v788_v55 = vsel %vm320_vm0, %v3077_v52, 0.0 }
 0x32b   :  { %813 = vadd.xlane.f32.xlu1 %v788_v55 }
 0x32d   :  { %815 = vadd.xlane.f32.xlu0 %v789_v56 }
 0x32e   :  { %v3088_v60 = vpop.f32.mrb[28].mxu0 }
 0x32f   :  { %817 = vadd.xlane.f32.xlu1 %v790_v59  ;;  %v3090_v62 = vpop.f32.mrb[29].mxu0  ;;  %v793_v11 = vsel %vm320_vm0, %v3088_v60, 0.0 }
 0x330   :  { %v3092_v7 = vpop.f32.mrb[30].mxu0  ;;  %v791_v8 = vsel %vm320_vm0, %v3090_v62, 0.0 }
 0x331   :  { %819 = vadd.xlane.f32.xlu0 %v791_v8  ;;  %v3097_v9 = vpop.f32.mrb[31].mxu0  ;;  %v794_v14 = vsel %vm320_vm0, %v3092_v7, 0.0 }
 0x332   :  { %v792_v10 = vsel %vm320_vm0, %v3097_v9, 0.0 }
 0x333   :  { %821 = vadd.xlane.f32.xlu1 %v792_v10 }
 0x335   :  { %823 = vadd.xlane.f32.xlu0 %v793_v11 }
 0x337   :  { %825 = vadd.xlane.f32.xlu1 %v794_v14 }
 0x3a5   :  { %v800_v6 = vpop.xlane.xlu1 %799 }
 0x3a6   :  { %v829_v17 = vmax.f32 %v800_v6, 1.0  ;;  %v796_v18 = vpop.xlane.xlu0 %795 }
 0x3a7   :  { %v827_v19 = vmax.f32 %v796_v18, 1.0 }
 0x3a8   :  { %2634 = vrcp.f32 %v829_v17 }
 0x3a9   :  { %v802_v20 = vpop.xlane.xlu1 %801  ;;  %2636 = vrcp.f32 %v827_v19 }
 0x3aa   :  { %v830_v21 = vmax.f32 %v802_v20, 1.0  ;;  %v798_v22 = vpop.xlane.xlu0 %797 }
 0x3ab   :  { %v828_v23 = vmax.f32 %v798_v22, 1.0 }
 0x3ac   :  { %2638 = vrcp.f32 %v830_v21 }
 0x3ad   :  { %2640 = vrcp.f32 %v828_v23 }
 0x3ae   :  { %v804_v24 = vpop.xlane.xlu0 %803 }
 0x3af   :  { %v831_v28 = vmax.f32 %v804_v24, 1.0 }
 0x3b0   :  { %v806_v30 = vpop.xlane.xlu1 %805 }
 0x3b1   :  { %2642 = vrcp.f32 %v831_v28  ;;  %v832_v34 = vmax.f32 %v806_v30, 1.0 }
 0x3b2   :  { %v808_v35 = vpop.xlane.xlu0 %807  ;;  %v2635_v41 = vpop.eup %2634 }
 0x3b3   :  { %2644 = vrcp.f32 %v832_v34  ;;  %v833_v39 = vmax.f32 %v808_v35, 1.0  ;;  %v2637_v45 = vpop.eup %2636  ;;  %v861_v57 = vmul.f32 %v2635_v41, %v3028_v26 }
 0x3b4   :  { %v810_v42 = vpop.xlane.xlu1 %809  ;;  %v859_v59 = vmul.f32 %v2637_v45, %v3030_v27 }
 0x3b5   :  { %2646 = vrcp.f32 %v833_v39  ;;  %v834_v47 = vmax.f32 %v810_v42, 1.0 }
 0x3b6   :  { %v2639_v49 = vpop.eup %2638  ;;  %v812_v51 = vpop.xlane.xlu0 %811 }
 0x3b7   :  { %v2641_v55 = vpop.eup %2640  ;;  %2648 = vrcp.f32 %v834_v47  ;;  %v835_v56 = vmax.f32 %v812_v51, 1.0  ;;  %v862_v58 = vmul.f32 %v2639_v49, %v3035_v29 }
 0x3b8   :  { %v860_v61 = vmul.f32 %v2641_v55, %v3040_v2  ;;  %v814_v1 = vpop.xlane.xlu1 %813 }
 0x3b9   :  { %2650 = vrcp.f32 %v835_v56  ;;  %v836_v8 = vmax.f32 %v814_v1, 1.0  ;;  %v876_v10 = vpack.c.bf16 %v862_v58, %v861_v57 }
 0x3ba   :  { %v816_v11 = vpop.xlane.xlu0 %815  ;;  %v875_v12 = vpack.c.bf16 %v860_v61, %v859_v59 }
 0x3bb   :  { %v2643_v13 = vpop.eup %2642  ;;  %2652 = vrcp.f32 %v836_v8  ;;  %v837_v14 = vmax.f32 %v816_v11, 1.0 }
 0x3bc   :  { %1016 = vmatmul.mubr.bf16.vlgmr.msra.gmra.mrb[16].mxu1 %v875_v12  ;;  %v818_v15 = vpop.xlane.xlu1 %817  ;;  %v863_v27 = vmul.f32 %v2643_v13, %v3050_v37 }
 0x3bd   :  { %v2645_v16 = vpop.eup %2644  ;;  %2654 = vrcp.f32 %v837_v14  ;;  %v838_v26 = vmax.f32 %v818_v15, 1.0  ;;  %1023 = vmatprep.mubr.bf16.mxu1 %v2988_v33 }
 0x3be   :  { %v820_v29 = vpop.xlane.xlu0 %819  ;;  %v864_v2 = vmul.f32 %v2645_v16, %v3057_v40 }
 0x3bf   :  { %v2647_v6 = vpop.eup %2646  ;;  %2656 = vrcp.f32 %v838_v26  ;;  %v839_v17 = vmax.f32 %v820_v29, 1.0 }
 0x3c0   :  { %v822_v18 = vpop.xlane.xlu1 %821  ;;  %v877_v19 = vpack.c.bf16 %v864_v2, %v863_v27  ;;  %v865_v23 = vmul.f32 %v2647_v6, %v3048_v36 }
 0x3c1   :  { %v2649_v20 = vpop.eup %2648  ;;  %2658 = vrcp.f32 %v839_v17  ;;  %v840_v21 = vmax.f32 %v822_v18, 1.0 }
 0x3c2   :  { %v824_v22 = vpop.xlane.xlu0 %823  ;;  %v866_v24 = vmul.f32 %v2649_v20, %v3052_v38 }
 0x3c3   :  { %v2651_v28 = vpop.eup %2650  ;;  %2660 = vrcp.f32 %v840_v21  ;;  %v841_v33 = vmax.f32 %v824_v22, 1.0 }
 0x3c4   :  { %1024 = vmatmul.mubr.bf16.gmra.mrb[20].mxu1 %v876_v10  ;;  %v826_v37 = vpop.xlane.xlu1 %825  ;;  %v878_v30 = vpack.c.bf16 %v866_v24, %v865_v23  ;;  %v867_v35 = vmul.f32 %v2651_v28, %v3070_v48 }
 0x3c5   :  { %v2653_v40 = vpop.eup %2652  ;;  %2662 = vrcp.f32 %v841_v33  ;;  %v842_v34 = vmax.f32 %v826_v37, 1.0  ;;  %1031 = vmatprep.mubr.bf16.mxu1 %v2995_v44 }
 0x3c6   :  { %v868_v39 = vmul.f32 %v2653_v40, %v3077_v52 }
 0x3c7   :  { %v2655_v41 = vpop.eup %2654  ;;  %2664 = vrcp.f32 %v842_v34  ;;  %v2604_v34 = vld [vmem:[#allocation8 + $0xd0] sm:$0xff]  }
 0x3c8   :  { %v879_v36 = vpack.c.bf16 %v868_v39, %v867_v35  ;;  %v869_v38 = vmul.f32 %v2655_v41, %v3068_v46 }
 0x3c9   :  { %v2657_v42 = vpop.eup %2656 }
 0x3ca   :  { %v870_v45 = vmul.f32 %v2657_v42, %v3072_v50  ;;  %v2603_v50 = vld [vmem:[#allocation8 + $0xc8] sm:$0xff]  }
 0x3cb   :  { %v2659_v47 = vpop.eup %2658 }
 0x3cc   :  { %1032 = vmatmul.mubr.bf16.gmra.mrb[24].mxu1 %v877_v19  ;;  %v880_v49 = vpack.c.bf16 %v870_v45, %v869_v38  ;;  %v871_v44 = vmul.f32 %v2659_v47, %v3090_v62  ;;  %v2605_v47 = vld [vmem:[#allocation8 + $0xd8] sm:$0xff]  }
 0x3cd   :  { %v2661_v51 = vpop.eup %2660  ;;  %1039 = vmatprep.mubr.bf16.mxu1 %v2993_v43  ;;  %v2602_v43 = vld [vmem:[#allocation8 + $0xc0] sm:$0xff]  }
 0x3ce   :  { %v872_v48 = vmul.f32 %v2661_v51, %v3097_v9  ;;  %2462 = vmatprep.subr.bf16.mxu0 %v2602_v43 }
 0x3cf   :  { %v2663_v55 = vpop.eup %2662  ;;  %2463 = vmatpush3.bf16.msra.mxu0 %v2602_v43 }
 0x3d0   :  { %v881_v52 = vpack.c.bf16 %v872_v48, %v871_v44  ;;  %v873_v57 = vmul.f32 %v2663_v55, %v3088_v60  ;;  %2464 = vmatprep.subr.bf16.mxu0 %v2603_v50  ;;  %v3132_v60 = vsub.s32 1, %v3012_v3 }
 0x3d1   :  { %v2665_v56 = vpop.eup %2664 }
 0x3d2   :  { %v874_v58 = vmul.f32 %v2665_v56, %v3092_v7 }
 0x3d3   :  { %2465 = vmatpush3.bf16.msra.mxu0 %v2603_v50 }
 0x3d4   :  { %1040 = vmatmul.mubr.bf16.gmra.mrb[28].mxu1 %v878_v30  ;;  %v882_v46 = vpack.c.bf16 %v874_v58, %v873_v57  ;;  %2466 = vmatprep.subr.bf16.mxu0 %v2604_v34 }
 0x3d5   :  { %1047 = vmatprep.mubr.bf16.mxu1 %v3001_v54 }
 0x3d7   :  { %2467 = vmatpush3.bf16.msra.mxu0 %v2604_v34 }
 0x3d8   :  { %2468 = vmatprep.subr.bf16.mxu0 %v2605_v47 }
 0x3db   :  { %2469 = vmatpush3.bf16.msra.mxu0 %v2605_v47 }
 0x3dc   :  { %1048 = vmatmul.mubr.bf16.gmra.mrb[32].mxu1 %v879_v36 }
 0x3dd   :  { %1055 = vmatprep.mubr.bf16.mxu1 %v2999_v53  ;;  %v3136_v53 = vrot.slane %v3020_v5, %v3132_v60 }
 0x3e4   :  { %1056 = vmatmul.mubr.bf16.gmra.mrb[36].mxu1 %v880_v49 }
 0x3e5   :  { %1063 = vmatprep.mubr.bf16.mxu1 %v3007_v0 }
 0x3ec   :  { %1064 = vmatmul.mubr.bf16.gmra.mrb[40].mxu1 %v881_v52  ;;  %v2606_v52 = vld [vmem:[#allocation8 + $0xe0] sm:$0xff]  }
 0x3ed   :  { %1071 = vmatprep.mubr.bf16.mxu1 %v3005_v63  ;;  %2470 = vmatprep.subr.bf16.mxu0 %v2606_v52 }
 0x3ee   :  { %2471 = vmatpush3.bf16.msra.mxu0 %v2606_v52 }
 0x3f4   :  { %1072 = vmatmul.mubr.bf16.gmra.mrb[44].mxu1 %v882_v46 }
 0x48f   :  { %v2216_v54 = vpop.f32.mrb[16].mxu1 }
 0x490   :  { %v2217_v62 = vpop.f32.mrb[17].mxu1 }
 0x491   :  { %v2218_v0 = vadd.f32 %v2217_v62, %v2216_v54  ;;  %v2219_v7 = vpop.f32.mrb[18].mxu1  ;;  %v2607_v62 = vld [vmem:[#allocation8 + $0xe8] sm:$0xff]  }
 0x492   :  { %v2220_v9 = vpop.f32.mrb[19].mxu1  ;;  %2472 = vmatprep.subr.bf16.mxu0 %v2607_v62 }
 0x493   :  { %v1018_v63 = vadd.f32 %v2218_v0, %v3136_v53  ;;  %v2221_v59 = vadd.f32 %v2220_v9, %v2219_v7  ;;  %2473 = vmatpush3.bf16.msra.mxu0 %v2607_v62 }
 0x495   :  { %v3139_v61 = vmax.f32 %v1018_v63, 0.0  ;;  %v1021_v1 = vadd.f32 %v2221_v59, %v3136_v53 }
 0x497   :  { %v3142_v8 = vmax.f32 %v1021_v1, 0.0  ;;  %v2222_v10 = vpop.f32.mrb[20].mxu1  ;;  %v1096_v11 = vmul.f32 %v3139_v61, %v3139_v61  ;;  %v2608_v1 = vld [vmem:[#allocation8 + $0xf0] sm:$0xff]  }
 0x498   :  { %v2223_v12 = vpop.f32.mrb[21].mxu1  ;;  %2474 = vmatprep.subr.bf16.mxu0 %v2608_v1 }
 0x499   :  { %v2224_v5 = vadd.f32 %v2223_v12, %v2222_v10  ;;  %v2225_v13 = vpop.f32.mrb[22].mxu1  ;;  %1112 = vadd.xlane.f32.xlu0 %v1096_v11  ;;  %v1097_v14 = vmul.f32 %v3142_v8, %v3142_v8  ;;  %2475 = vmatpush3.bf16.msra.mxu0 %v2608_v1 }
 0x49a   :  { %v2226_v15 = vpop.f32.mrb[23].mxu1 }
 0x49b   :  { %v1026_v16 = vadd.f32 %v2224_v5, %v3136_v53  ;;  %v2227_v26 = vadd.f32 %v2226_v15, %v2225_v13  ;;  %1114 = vadd.xlane.f32.xlu1 %v1097_v14 }
 0x49d   :  { %v3149_v29 = vmax.f32 %v1026_v16, 0.0  ;;  %v1029_v27 = vadd.f32 %v2227_v26, %v3136_v53  ;;  %v2609_v16 = vld [vmem:[#allocation8 + $0xf8] sm:$0xff]  }
 0x49e   :  { %2476 = vmatprep.subr.bf16.mxu0 %v2609_v16 }
 0x49f   :  { %v3152_v2 = vmax.f32 %v1029_v27, 0.0  ;;  %v2228_v6 = vpop.f32.mrb[24].mxu1  ;;  %v1098_v17 = vmul.f32 %v3149_v29, %v3149_v29  ;;  %2477 = vmatpush3.bf16.msra.mxu0 %v2609_v16 }
 0x4a0   :  { %v2229_v18 = vpop.f32.mrb[25].mxu1 }
 0x4a1   :  { %v2230_v19 = vadd.f32 %v2229_v18, %v2228_v6  ;;  %v2231_v20 = vpop.f32.mrb[26].mxu1  ;;  %1116 = vadd.xlane.f32.xlu0 %v1098_v17  ;;  %v1099_v21 = vmul.f32 %v3152_v2, %v3152_v2 }
 0x4a2   :  { %v2232_v22 = vpop.f32.mrb[27].mxu1 }
 0x4a3   :  { %v1034_v23 = vadd.f32 %v2230_v19, %v3136_v53  ;;  %v2233_v24 = vadd.f32 %v2232_v22, %v2231_v20  ;;  %1118 = vadd.xlane.f32.xlu1 %v1099_v21 }
 0x4a5   :  { %v3159_v28 = vmax.f32 %v1034_v23, 0.0  ;;  %v1037_v33 = vadd.f32 %v2233_v24, %v3136_v53 }
 0x4a7   :  { %v3162_v37 = vmax.f32 %v1037_v33, 0.0  ;;  %v2234_v30 = vpop.f32.mrb[28].mxu1  ;;  %v1100_v40 = vmul.f32 %v3159_v28, %v3159_v28 }
 0x4a8   :  { %v2235_v35 = vpop.f32.mrb[29].mxu1 }
 0x4a9   :  { %v2236_v39 = vadd.f32 %v2235_v35, %v2234_v30  ;;  %v2237_v41 = vpop.f32.mrb[30].mxu1  ;;  %1120 = vadd.xlane.f32.xlu0 %v1100_v40  ;;  %v1101_v36 = vmul.f32 %v3162_v37, %v3162_v37 }
 0x4aa   :  { %v2238_v42 = vpop.f32.mrb[31].mxu1 }
 0x4ab   :  { %v1042_v38 = vadd.f32 %v2236_v39, %v3136_v53  ;;  %v2239_v45 = vadd.f32 %v2238_v42, %v2237_v41  ;;  %1122 = vadd.xlane.f32.xlu1 %v1101_v36 }
 0x4ad   :  { %v3169_v49 = vmax.f32 %v1042_v38, 0.0  ;;  %v1045_v51 = vadd.f32 %v2239_v45, %v3136_v53 }
 0x4af   :  { %v3172_v44 = vmax.f32 %v1045_v51, 0.0  ;;  %v2240_v48 = vpop.f32.mrb[32].mxu1  ;;  %v1102_v55 = vmul.f32 %v3169_v49, %v3169_v49 }
 0x4b0   :  { %v2241_v56 = vpop.f32.mrb[33].mxu1 }
 0x4b1   :  { %v2242_v57 = vadd.f32 %v2241_v56, %v2240_v48  ;;  %v2243_v58 = vpop.f32.mrb[34].mxu1  ;;  %1124 = vadd.xlane.f32.xlu0 %v1102_v55  ;;  %v1103_v46 = vmul.f32 %v3172_v44, %v3172_v44 }
 0x4b2   :  { %v2244_v43 = vpop.f32.mrb[35].mxu1 }
 0x4b3   :  { %v1050_v50 = vadd.f32 %v2242_v57, %v3136_v53  ;;  %v2245_v54 = vadd.f32 %v2244_v43, %v2243_v58  ;;  %1126 = vadd.xlane.f32.xlu1 %v1103_v46 }
 0x4b5   :  { %v3179_v0 = vmax.f32 %v1050_v50, 0.0  ;;  %v1053_v7 = vadd.f32 %v2245_v54, %v3136_v53 }
 0x4b7   :  { %v3182_v9 = vmax.f32 %v1053_v7, 0.0  ;;  %v2246_v63 = vpop.f32.mrb[36].mxu1  ;;  %v1104_v59 = vmul.f32 %v3179_v0, %v3179_v0 }
 0x4b8   :  { %v2247_v10 = vpop.f32.mrb[37].mxu1 }
 0x4b9   :  { %v2248_v11 = vadd.f32 %v2247_v10, %v2246_v63  ;;  %v2249_v12 = vpop.f32.mrb[38].mxu1  ;;  %1128 = vadd.xlane.f32.xlu0 %v1104_v59  ;;  %v1105_v5 = vmul.f32 %v3182_v9, %v3182_v9 }
 0x4ba   :  { %v2250_v13 = vpop.f32.mrb[39].mxu1 }
 0x4bb   :  { %v1058_v14 = vadd.f32 %v2248_v11, %v3136_v53  ;;  %v2251_v15 = vadd.f32 %v2250_v13, %v2249_v12  ;;  %1130 = vadd.xlane.f32.xlu1 %v1105_v5 }
 0x4bd   :  { %v3189_v26 = vmax.f32 %v1058_v14, 0.0  ;;  %v1061_v27 = vadd.f32 %v2251_v15, %v3136_v53 }
 0x4bf   :  { %v3192_v6 = vmax.f32 %v1061_v27, 0.0  ;;  %v2252_v17 = vpop.f32.mrb[40].mxu1  ;;  %v1106_v18 = vmul.f32 %v3189_v26, %v3189_v26 }
 0x4c0   :  { %v2253_v19 = vpop.f32.mrb[41].mxu1 }
 0x4c1   :  { %v2254_v20 = vadd.f32 %v2253_v19, %v2252_v17  ;;  %1132 = vadd.xlane.f32.xlu0 %v1106_v18  ;;  %v2255_v21 = vpop.f32.mrb[42].mxu1  ;;  %v1107_v22 = vmul.f32 %v3192_v6, %v3192_v6 }
 0x4c2   :  { %v2256_v23 = vpop.f32.mrb[43].mxu1 }
 0x4c3   :  { %v1066_v24 = vadd.f32 %v2254_v20, %v3136_v53  ;;  %v2257_v33 = vadd.f32 %v2256_v23, %v2255_v21  ;;  %1134 = vadd.xlane.f32.xlu1 %v1107_v22 }
 0x4c5   :  { %v3199_v30 = vmax.f32 %v1066_v24, 0.0  ;;  %v1069_v40 = vadd.f32 %v2257_v33, %v3136_v53 }
 0x4c7   :  { %v3202_v34 = vmax.f32 %v1069_v40, 0.0  ;;  %v2258_v35 = vpop.f32.mrb[44].mxu1  ;;  %v1108_v39 = vmul.f32 %v3199_v30, %v3199_v30 }
 0x4c8   :  { %v2259_v41 = vpop.f32.mrb[45].mxu1 }
 0x4c9   :  { %v2260_v36 = vadd.f32 %v2259_v41, %v2258_v35  ;;  %1136 = vadd.xlane.f32.xlu0 %v1108_v39  ;;  %v2261_v42 = vpop.f32.mrb[46].mxu1  ;;  %v1109_v38 = vmul.f32 %v3202_v34, %v3202_v34 }
 0x4ca   :  { %v2262_v45 = vpop.f32.mrb[47].mxu1 }
 0x4cb   :  { %v1074_v47 = vadd.f32 %v2260_v36, %v3136_v53  ;;  %v2263_v51 = vadd.f32 %v2262_v45, %v2261_v42  ;;  %1138 = vadd.xlane.f32.xlu1 %v1109_v38 }
 0x4cd   :  { %v3209_v48 = vmax.f32 %v1074_v47, 0.0  ;;  %v1077_v55 = vadd.f32 %v2263_v51, %v3136_v53 }
 0x4cf   :  { %v3212_v52 = vmax.f32 %v1077_v55, 0.0  ;;  %v1110_v56 = vmul.f32 %v3209_v48, %v3209_v48 }
 0x4d1   :  { %1140 = vadd.xlane.f32.xlu0 %v1110_v56  ;;  %v1111_v57 = vmul.f32 %v3212_v52, %v3212_v52 }
 0x4d3   :  { %1142 = vadd.xlane.f32.xlu1 %v1111_v57 }
 0x526   :  { %v1113_v58 = vpop.xlane.xlu0 %1112 }
 0x527   :  { %2666 = vrsqrt.f32 %v1113_v58  ;;  %vm1144_vm1 = vcmp.eq.f32.partialorder %v1113_v58, 0.0 }
 0x528   :  { %v1115_v46 = vpop.xlane.xlu1 %1114 }
 0x529   :  { %2668 = vrsqrt.f32 %v1115_v46  ;;  %vm1145_vm2 = vcmp.eq.f32.partialorder %v1115_v46, 0.0 }
 0x52e   :  { %v1117_v43 = vpop.xlane.xlu0 %1116 }
 0x52f   :  { %2670 = vrsqrt.f32 %v1117_v43  ;;  %vm1146_vm3 = vcmp.eq.f32.partialorder %v1117_v43, 0.0 }
 0x530   :  { %v1119_v50 = vpop.xlane.xlu1 %1118 }
 0x531   :  { %v2667_v54 = vpop.eup %2666  ;;  %2672 = vrsqrt.f32 %v1119_v50  ;;  %vm1147_vm4 = vcmp.eq.f32.partialorder %v1119_v50, 0.0 }
 0x532   :  { %v1176_v53 = vsel %vm1144_vm1, 1.0, %v2667_v54 }
 0x533   :  { %v2669_v62 = vpop.eup %2668  ;;  %v1192_v63 = vmul.f32 %v1176_v53, %v3139_v61 }
 0x534   :  { %v1177_v7 = vsel %vm1145_vm2, 1.0, %v2669_v62  ;;  %vm2859_vm2 = vmmov 0  }
 0x535   :  { %v1193_v59 = vmul.f32 %v1177_v7, %v3142_v8 }
 0x536   :  { %v1121_v1 = vpop.xlane.xlu0 %1120 }
 0x537   :  { %2674 = vrsqrt.f32 %v1121_v1  ;;  %v1208_v10 = vpack.c.bf16 %v1193_v59, %v1192_v63  ;;  %vm1148_vm5 = vcmp.eq.f32.partialorder %v1121_v1, 0.0 }
 0x538   :  { %v1123_v11 = vpop.xlane.xlu1 %1122 }
 0x539   :  { %v2671_v12 = vpop.eup %2670  ;;  %2676 = vrsqrt.f32 %v1123_v11  ;;  %2478 = vmatprep.mubr.bf16.mxu0 %v1208_v10  ;;  %1770 = vmatprep.mubr.bf16.mxu1 %v1208_v10  ;;  %vm1149_vm6 = vcmp.eq.f32.partialorder %v1123_v11, 0.0 }
 0x53a   :  { %v1178_v5 = vsel %vm1146_vm3, 1.0, %v2671_v12 }
 0x53b   :  { %v2673_v13 = vpop.eup %2672  ;;  %v1194_v15 = vmul.f32 %v1178_v5, %v3149_v29 }
 0x53c   :  { %v1179_v14 = vsel %vm1147_vm4, 1.0, %v2673_v13 }
 0x53d   :  { %v1195_v16 = vmul.f32 %v1179_v14, %v3152_v2 }
 0x53e   :  { %v1125_v61 = vpop.xlane.xlu0 %1124 }
 0x53f   :  { %v3222_v27 = vpack.c.bf16 %v1195_v16, %v1194_v15  ;;  %2678 = vrsqrt.f32 %v1125_v61  ;;  %vm1150_vm7 = vcmp.eq.f32.partialorder %v1125_v61, 0.0 }
 0x540   :  { %v1127_v8 = vpop.xlane.xlu1 %1126 }
 0x541   :  { %v2675_v17 = vpop.eup %2674  ;;  %2680 = vrsqrt.f32 %v1127_v8  ;;  %2479 = vmatmul.mubr.bf16.vlgmr.msra.gmra.mrb[32].mxu0 %v3222_v27  ;;  %vm1151_vm8 = vcmp.eq.f32.partialorder %v1127_v8, 0.0 }
 0x542   :  { %v1180_v18 = vsel %vm1148_vm5, 1.0, %v2675_v17 }
 0x543   :  { %v2677_v19 = vpop.eup %2676  ;;  %v1196_v21 = vmul.f32 %v1180_v18, %v3159_v28 }
 0x544   :  { %v1181_v20 = vsel %vm1149_vm6, 1.0, %v2677_v19 }
 0x545   :  { %v1197_v29 = vmul.f32 %v1181_v20, %v3162_v37 }
 0x546   :  { %v1129_v22 = vpop.xlane.xlu0 %1128 }
 0x547   :  { %2682 = vrsqrt.f32 %v1129_v22  ;;  %v3227_v2 = vpack.c.bf16 %v1197_v29, %v1196_v21  ;;  %vm1152_vm9 = vcmp.eq.f32.partialorder %v1129_v22, 0.0 }
 0x548   :  { %v1131_v23 = vpop.xlane.xlu1 %1130 }
 0x549   :  { %v2679_v24 = vpop.eup %2678  ;;  %2684 = vrsqrt.f32 %v1131_v23  ;;  %2482 = vmatprep.mubr.bf16.mxu0 %v3227_v2  ;;  %vm1153_vm10 = vcmp.eq.f32.partialorder %v1131_v23, 0.0 }
 0x54a   :  { %v1182_v33 = vsel %vm1150_vm7, 1.0, %v2679_v24 }
 0x54b   :  { %v2681_v40 = vpop.eup %2680  ;;  %v1198_v39 = vmul.f32 %v1182_v33, %v3169_v49 }
 0x54c   :  { %v1183_v35 = vsel %vm1151_vm8, 1.0, %v2681_v40 }
 0x54d   :  { %v1199_v28 = vmul.f32 %v1183_v35, %v3172_v44 }
 0x54e   :  { %v1133_v41 = vpop.xlane.xlu0 %1132 }
 0x54f   :  { %2686 = vrsqrt.f32 %v1133_v41  ;;  %v3232_v37 = vpack.c.bf16 %v1199_v28, %v1198_v39  ;;  %vm1154_vm11 = vcmp.eq.f32.partialorder %v1133_v41, 0.0 }
 0x550   :  { %v1135_v36 = vpop.xlane.xlu1 %1134 }
 0x551   :  { %v2683_v42 = vpop.eup %2682  ;;  %2688 = vrsqrt.f32 %v1135_v36  ;;  %2483 = vmatmul.mubr.bf16.gmra.mrb[36].mxu0 %v3232_v37  ;;  %vm1155_vm12 = vcmp.eq.f32.partialorder %v1135_v36, 0.0 }
 0x552   :  { %v1184_v38 = vsel %vm1152_vm9, 1.0, %v2683_v42  ;;  %vm1907_vm9 = vcmask 130048  }
 0x553   :  { %v2685_v45 = vpop.eup %2684  ;;  %v1200_v51 = vmul.f32 %v1184_v38, %v3179_v0 }
 0x554   :  { %v1185_v47 = vsel %vm1153_vm10, 1.0, %v2685_v45 }
 0x555   :  { %v1201_v49 = vmul.f32 %v1185_v47, %v3182_v9 }
 0x556   :  { %v1137_v55 = vpop.xlane.xlu0 %1136 }
 0x557   :  { %2690 = vrsqrt.f32 %v1137_v55  ;;  %v3237_v44 = vpack.c.bf16 %v1201_v49, %v1200_v51  ;;  %vm1156_vm13 = vcmp.eq.f32.partialorder %v1137_v55, 0.0 }
 0x558   :  { %v1139_v56 = vpop.xlane.xlu1 %1138 }
 0x559   :  { %v2687_v57 = vpop.eup %2686  ;;  %2692 = vrsqrt.f32 %v1139_v56  ;;  %2486 = vmatprep.mubr.bf16.mxu0 %v3237_v44  ;;  %vm1157_vm14 = vcmp.eq.f32.partialorder %v1139_v56, 0.0 }
 0x55a   :  { %v1186_v58 = vsel %vm1154_vm11, 1.0, %v2687_v57 }
 0x55b   :  { %v2689_v46 = vpop.eup %2688  ;;  %v1202_v50 = vmul.f32 %v1186_v58, %v3189_v26 }
 0x55c   :  { %v1187_v43 = vsel %vm1155_vm12, 1.0, %v2689_v46 }
 0x55d   :  { %v1203_v0 = vmul.f32 %v1187_v43, %v3192_v6 }
 0x55e   :  { %v1141_v54 = vpop.xlane.xlu0 %1140 }
 0x55f   :  { %2694 = vrsqrt.f32 %v1141_v54  ;;  %v3242_v9 = vpack.c.bf16 %v1203_v0, %v1202_v50  ;;  %vm1158_vm15 = vcmp.eq.f32.partialorder %v1141_v54, 0.0 }
 0x560   :  { %v1143_v53 = vpop.xlane.xlu1 %1142 }
 0x561   :  { %v2691_v62 = vpop.eup %2690  ;;  %2696 = vrsqrt.f32 %v1143_v53  ;;  %2487 = vmatmul.mubr.bf16.gmra.mrb[40].mxu0 %v3242_v9  ;;  %vm1159_vm1 = vcmp.eq.f32.partialorder %v1143_v53, 0.0 }
 0x562   :  { %v1188_v7 = vsel %vm1156_vm13, 1.0, %v2691_v62 }
 0x563   :  { %v2693_v63 = vpop.eup %2692  ;;  %v1204_v1 = vmul.f32 %v1188_v7, %v3199_v30  ;;  %v2610_v30 = vld [vmem:[#allocation7 + $0x40] sm:$0xff]  }
 0x564   :  { %v1189_v59 = vsel %vm1157_vm14, 1.0, %v2693_v63 }
 0x565   :  { %v1205_v26 = vmul.f32 %v1189_v59, %v3202_v34  ;;  %v3258_v34 = vld [vmem:[%s3418_s5 + $0x2] sm:$0x3] }
 0x566   :  { %v1219_v16 = vrot.slane %v3258_v34, %v3015_v4 }
 0x567   :  { %v3247_v10 = vpack.c.bf16 %v1205_v26, %v1204_v1 }
 0x569   :  { %v2695_v6 = vpop.eup %2694  ;;  %2490 = vmatprep.mubr.bf16.mxu0 %v3247_v10 }
 0x56a   :  { %v1190_v11 = vsel %vm1158_vm15, 1.0, %v2695_v6  ;;  %vm2037_vm15 = vcmp.lt.s32.totalorder %v3025_v25, 16 }
 0x56b   :  { %v2697_v12 = vpop.eup %2696  ;;  %v1206_v13 = vmul.f32 %v1190_v11, %v3209_v48 }
 0x56c   :  { %v1191_v5 = vsel %vm1159_vm1, 1.0, %v2697_v12 }
 0x56d   :  { %v1207_v14 = vmul.f32 %v1191_v5, %v3212_v52 }
 0x56f   :  { %v3252_v15 = vpack.c.bf16 %v1207_v14, %v1206_v13 }
 0x571   :  { %2491 = vmatmul.mubr.bf16.gmra.mrb[44].mxu0 %v3252_v15 }
 0x572   :  { %2510 = vmatprep.mubr.bf16.mxu0 %v2610_v30 }
 0x614   :  { %v2480_v61 = vpop.f32.mrb[32].mxu0 }
 0x615   :  { %v1311_v8 = vadd.f32 %v2480_v61, %v1219_v16  ;;  %v1302_v17 = vpop.f32.mrb[33].mxu0 }
 0x616   :  { %v1303_v48 = vadd.f32 %v1302_v17, %v1219_v16  ;;  %v2481_v18 = vpop.f32.mrb[34].mxu0 }
 0x617   :  { %v1314_v52 = vadd.f32 %v2481_v18, %v1219_v16  ;;  %v1305_v19 = vpop.f32.mrb[35].mxu0  ;;  %v1367_v21 = vmax.f32 %v1311_v8, 0.0 }
 0x618   :  { %v1306_v20 = vadd.f32 %v1305_v19, %v1219_v16  ;;  %v1365_v22 = vmax.f32 %v1303_v48, 0.0 }
 0x619   :  { %v1368_v29 = vmax.f32 %v1314_v52, 0.0 }
 0x61a   :  { %v1366_v23 = vmax.f32 %v1306_v20, 0.0  ;;  %v2611_v20 = vld [vmem:[#allocation7 + $0x48] sm:$0xff]  }
 0x61b   :  { %v1382_v24 = vpack.c.bf16 %v1368_v29, %v1367_v21  ;;  %v2612_v21 = vld [vmem:[#allocation8 + $0x140] sm:$0xff]  }
 0x61c   :  { %v1381_v33 = vpack.c.bf16 %v1366_v23, %v1365_v22  ;;  %v2613_v29 = vld [vmem:[#allocation8 + $0x100] sm:$0xff]   ;;  %v2614_v22 = vld [vmem:[#allocation8 + $0x148] sm:$0xff]   ;;  %2296 = vmatprep.subr.bf16.mxu1 %v2612_v21 }
 0x61d   :  { %2297 = vmatpush3.bf16.msra.mxu1 %v2613_v29  ;;  %v2615_v23 = vld [vmem:[#allocation8 + $0x108] sm:$0xff]  }
 0x61e   :  { %2494 = vmatprep.subr.bf16.mxu0 %v1381_v33  ;;  %2298 = vmatprep.subr.bf16.mxu1 %v2614_v22 }
 0x61f   :  { %2495 = vmatpush3.bf16.msra.mxu0 %v1381_v33  ;;  %v2618_v33 = vld [vmem:[#allocation8 + $0x158] sm:$0xff]  }
 0x620   :  { %2496 = vmatprep.subr.bf16.mxu0 %v1382_v24 }
 0x621   :  { %2299 = vmatpush3.bf16.msra.mxu1 %v2615_v23 }
 0x623   :  { %2497 = vmatpush3.bf16.msra.mxu0 %v1382_v24  ;;  %v2617_v24 = vld [vmem:[#allocation8 + $0x110] sm:$0xff]  }
 0x624   :  { %v2484_v40 = vpop.f32.mrb[36].mxu0 }
 0x625   :  { %v1327_v35 = vadd.f32 %v2484_v40, %v1219_v16  ;;  %v1318_v39 = vpop.f32.mrb[37].mxu0 }
 0x626   :  { %v1319_v28 = vadd.f32 %v1318_v39, %v1219_v16  ;;  %v2485_v41 = vpop.f32.mrb[38].mxu0 }
 0x627   :  { %v1330_v36 = vadd.f32 %v2485_v41, %v1219_v16  ;;  %v1321_v42 = vpop.f32.mrb[39].mxu0  ;;  %v1371_v45 = vmax.f32 %v1327_v35, 0.0 }
 0x628   :  { %v1322_v38 = vadd.f32 %v1321_v42, %v1219_v16  ;;  %v1369_v51 = vmax.f32 %v1319_v28, 0.0  ;;  %v2619_v42 = vld [vmem:[#allocation8 + $0x118] sm:$0xff]  }
 0x629   :  { %v1372_v47 = vmax.f32 %v1330_v36, 0.0 }
 0x62a   :  { %v1370_v49 = vmax.f32 %v1322_v38, 0.0  ;;  %v2620_v38 = vld [vmem:[#allocation8 + $0x160] sm:$0xff]  }
 0x62b   :  { %v1384_v55 = vpack.c.bf16 %v1372_v47, %v1371_v45  ;;  %v2621_v45 = vld [vmem:[#allocation8 + $0x120] sm:$0xff]   ;;  %v2622_v47 = vld [vmem:[#allocation8 + $0x168] sm:$0xff]  }
 0x62c   :  { %v1383_v56 = vpack.c.bf16 %v1370_v49, %v1369_v51  ;;  %v2623_v51 = vld [vmem:[#allocation8 + $0x128] sm:$0xff]   ;;  %v2624_v49 = vld [vmem:[#allocation8 + $0x170] sm:$0xff]  }
 0x62e   :  { %2498 = vmatprep.subr.bf16.mxu0 %v1383_v56 }
 0x62f   :  { %2499 = vmatpush3.bf16.msra.mxu0 %v1383_v56  ;;  %v2626_v56 = vld [vmem:[#allocation8 + $0x178] sm:$0xff]  }
 0x630   :  { %2500 = vmatprep.subr.bf16.mxu0 %v1384_v55 }
 0x633   :  { %2501 = vmatpush3.bf16.msra.mxu0 %v1384_v55  ;;  %v2625_v55 = vld [vmem:[#allocation8 + $0x130] sm:$0xff]  }
 0x634   :  { %v2488_v57 = vpop.f32.mrb[40].mxu0 }
 0x635   :  { %v1343_v58 = vadd.f32 %v2488_v57, %v1219_v16  ;;  %v1334_v46 = vpop.f32.mrb[41].mxu0  ;;  %v2627_v57 = vld [vmem:[#allocation8 + $0x138] sm:$0xff]  }
 0x636   :  { %v1335_v43 = vadd.f32 %v1334_v46, %v1219_v16  ;;  %v2489_v50 = vpop.f32.mrb[42].mxu0  ;;  %v2629_v46 = vld [vmem:[#allocation7 + $0x58] sm:$0xff]  }
 0x637   :  { %v1346_v0 = vadd.f32 %v2489_v50, %v1219_v16  ;;  %v1337_v54 = vpop.f32.mrb[43].mxu0  ;;  %v1375_v62 = vmax.f32 %v1343_v58, 0.0  ;;  %v2628_v58 = vld [vmem:[#allocation7 + $0x50] sm:$0xff]   ;;  %v2631_v50 = vld [vmem:[#allocation7 + $0x68] sm:$0xff]  }
 0x638   :  { %v1338_v53 = vadd.f32 %v1337_v54, %v1219_v16  ;;  %v1373_v63 = vmax.f32 %v1335_v43, 0.0  ;;  %v2630_v43 = vld [vmem:[#allocation7 + $0x60] sm:$0xff]   ;;  %v2633_v54 = vld [vmem:[#allocation7 + $0x78] sm:$0xff]  }
 0x639   :  { %v1376_v7 = vmax.f32 %v1346_v0, 0.0  ;;  %v2632_v0 = vld [vmem:[#allocation7 + $0x70] sm:$0xff]  }
 0x63a   :  { %v1374_v59 = vmax.f32 %v1338_v53, 0.0 }
 0x63b   :  { %v1386_v1 = vpack.c.bf16 %v1376_v7, %v1375_v62 }
 0x63c   :  { %v1385_v26 = vpack.c.bf16 %v1374_v59, %v1373_v63 }
 0x63e   :  { %2502 = vmatprep.subr.bf16.mxu0 %v1385_v26 }
 0x63f   :  { %2503 = vmatpush3.bf16.msra.mxu0 %v1385_v26 }
 0x640   :  { %2504 = vmatprep.subr.bf16.mxu0 %v1386_v1 }
 0x643   :  { %2505 = vmatpush3.bf16.msra.mxu0 %v1386_v1 }
 0x644   :  { %v2492_v6 = vpop.f32.mrb[44].mxu0 }
 0x645   :  { %v1359_v11 = vadd.f32 %v2492_v6, %v1219_v16  ;;  %v1350_v12 = vpop.f32.mrb[45].mxu0 }
 0x646   :  { %v1351_v5 = vadd.f32 %v1350_v12, %v1219_v16  ;;  %v2493_v13 = vpop.f32.mrb[46].mxu0 }
 0x647   :  { %v1362_v14 = vadd.f32 %v2493_v13, %v1219_v16  ;;  %v1353_v30 = vpop.f32.mrb[47].mxu0  ;;  %v1379_v8 = vmax.f32 %v1359_v11, 0.0 }
 0x648   :  { %v1354_v61 = vadd.f32 %v1353_v30, %v1219_v16  ;;  %v1377_v48 = vmax.f32 %v1351_v5, 0.0  ;;  %v2616_v16 = vld [vmem:[#allocation8 + $0x150] sm:$0xff]  }
 0x649   :  { %v1380_v17 = vmax.f32 %v1362_v14, 0.0  ;;  %2300 = vmatprep.subr.bf16.mxu1 %v2616_v16 }
 0x64a   :  { %v1378_v18 = vmax.f32 %v1354_v61, 0.0  ;;  %2301 = vmatpush3.bf16.msra.mxu1 %v2617_v24 }
 0x64b   :  { %v1388_v52 = vpack.c.bf16 %v1380_v17, %v1379_v8  ;;  %2302 = vmatprep.subr.bf16.mxu1 %v2618_v33 }
 0x64c   :  { %v1387_v19 = vpack.c.bf16 %v1378_v18, %v1377_v48 }
 0x64e   :  { %2506 = vmatprep.subr.bf16.mxu0 %v1387_v19  ;;  %2303 = vmatpush3.bf16.msra.mxu1 %v2619_v42 }
 0x64f   :  { %2507 = vmatpush3.bf16.msra.mxu0 %v1387_v19  ;;  %2304 = vmatprep.subr.bf16.mxu1 %v2620_v38 }
 0x650   :  { %2508 = vmatprep.subr.bf16.mxu0 %v1388_v52 }
 0x652   :  { %2305 = vmatpush3.bf16.msra.mxu1 %v2621_v45 }
 0x653   :  { %2509 = vmatpush3.bf16.msra.mxu0 %v1388_v52  ;;  %2306 = vmatprep.subr.bf16.mxu1 %v2622_v47 }
 0x656   :  { %2511 = vmatmul.mubr.bf16.vlgmr.msra.gmra.mrb[48].mxu0 %v2611_v20  ;;  %2307 = vmatpush3.bf16.msra.mxu1 %v2623_v51  ;;  %v1641_v20 = vrot.slane %v3258_v34, %v3132_v60 }
 0x657   :  { %2308 = vmatprep.subr.bf16.mxu1 %v2624_v49  ;;  %2514 = vmatprep.mubr.bf16.mxu0 %v2628_v58 }
 0x65a   :  { %2309 = vmatpush3.bf16.msra.mxu1 %v2625_v55 }
 0x65b   :  { %2310 = vmatprep.subr.bf16.mxu1 %v2626_v56 }
 0x65e   :  { %2311 = vmatpush3.bf16.msra.mxu1 %v2627_v57  ;;  %2515 = vmatmul.mubr.bf16.gmra.mrb[52].mxu0 %v2629_v46 }
 0x65f   :  { %2518 = vmatprep.mubr.bf16.mxu0 %v2630_v43 }
 0x666   :  { %2519 = vmatmul.mubr.bf16.gmra.mrb[56].mxu0 %v2631_v50 }
 0x667   :  { %2522 = vmatprep.mubr.bf16.mxu0 %v2632_v0  ;;  %v2858_v0 = vmov 0.0  }
 0x668   :  { %2526 = vmatprep.subr.bf16.mxu0 %v2858_v0 }
 0x66e   :  { %2523 = vmatmul.mubr.bf16.gmra.mrb[60].mxu0 %v2633_v54 }
 0x66f   :  { %2528 = vmatprep.mubr.msk.bf16.mxu0 %vm2859_vm2, %v2858_v0 }
 0x729   :  { %v3262_v40 = vpop.f32.mrb[48].mxu0 }
 0x72a   :  { %v1471_v35 = vpop.f32.mrb[49].mxu0  ;;  %v1536_v34 = vsel %vm320_vm0, %v3262_v40, 0.0 }
 0x72b   :  { %v3264_v39 = vpop.f32.mrb[50].mxu0  ;;  %v1534_v28 = vsel %vm320_vm0, %v1471_v35, 0.0 }
 0x72c   :  { %1550 = vadd.xlane.f32.xlu0 %v1534_v28  ;;  %v1474_v41 = vpop.f32.mrb[51].mxu0  ;;  %v1537_v42 = vsel %vm320_vm0, %v3264_v39, 0.0 }
 0x72d   :  { %v1535_v36 = vsel %vm320_vm0, %v1474_v41, 0.0 }
 0x72e   :  { %1552 = vadd.xlane.f32.xlu1 %v1535_v36 }
 0x731   :  { %v3271_v12 = vpop.f32.mrb[52].mxu0 }
 0x732   :  { %v3273_v5 = vpop.f32.mrb[53].mxu0  ;;  %v1540_v47 = vsel %vm320_vm0, %v3271_v12, 0.0 }
 0x733   :  { %v3275_v13 = vpop.f32.mrb[54].mxu0  ;;  %v1538_v38 = vsel %vm320_vm0, %v3273_v5, 0.0 }
 0x734   :  { %v3277_v14 = vpop.f32.mrb[55].mxu0  ;;  %v1541_v51 = vsel %vm320_vm0, %v3275_v13, 0.0 }
 0x735   :  { %v1539_v45 = vsel %vm320_vm0, %v3277_v14, 0.0 }
 0x739   :  { %v3279_v30 = vpop.f32.mrb[56].mxu0 }
 0x73a   :  { %v3281_v61 = vpop.f32.mrb[57].mxu0  ;;  %v1544_v56 = vsel %vm320_vm0, %v3279_v30, 0.0 }
 0x73b   :  { %v3283_v8 = vpop.f32.mrb[58].mxu0  ;;  %v1542_v49 = vsel %vm320_vm0, %v3281_v61, 0.0 }
 0x73c   :  { %v3285_v17 = vpop.f32.mrb[59].mxu0  ;;  %v1545_v57 = vsel %vm320_vm0, %v3283_v8, 0.0 }
 0x73d   :  { %v1543_v55 = vsel %vm320_vm0, %v3285_v17, 0.0 }
 0x741   :  { %v3287_v48 = vpop.f32.mrb[60].mxu0 }
 0x742   :  { %v3289_v18 = vpop.f32.mrb[61].mxu0  ;;  %v1548_v43 = vsel %vm320_vm0, %v3287_v48, 0.0 }
 0x743   :  { %v1546_v58 = vsel %vm320_vm0, %v3289_v18, 0.0 }
 0x7b9   :  { %v1551_v53 = vpop.xlane.xlu0 %1550 }
 0x7ba   :  { %v1582_v62 = vmax.f32 %v1551_v53, 1.0 }
 0x7bb   :  { %v1553_v7 = vpop.xlane.xlu1 %1552 }
 0x7bc   :  { %2698 = vrcp.f32 %v1582_v62  ;;  %v1583_v63 = vmax.f32 %v1553_v7, 1.0 }
 0x7be   :  { %2700 = vrcp.f32 %v1583_v63 }
 0x7c6   :  { %v2699_v59 = vpop.eup %2698 }
 0x7c7   :  { %v1614_v26 = vmul.f32 %v2699_v59, %v1471_v35 }
 0x7c8   :  { %v2701_v1 = vpop.eup %2700 }
 0x7c9   :  { %v1615_v6 = vmul.f32 %v2701_v1, %v1474_v41 }
 0x7cb   :  { %v1630_v11 = vpack.c.bf16 %v1615_v6, %v1614_v26 }
 0x7cd   :  { %1771 = vmatmul.mubr.bf16.vlgmr.msra.gmra.mrb[48].mxu1 %v1630_v11 }
 0x7ce   :  { %1778 = vmatprep.mubr.bf16.mxu1 %v3222_v27  ;;  %v3291_v27 = vpop.f32.mrb[62].mxu0 }
 0x7cf   :  { %v3293_v52 = vpop.f32.mrb[63].mxu0  ;;  %v1549_v50 = vsel %vm320_vm0, %v3291_v27, 0.0 }
 0x7d0   :  { %v1547_v46 = vsel %vm320_vm0, %v3293_v52, 0.0 }
 0x8a0   :  { %v2312_v19 = vpop.f32.mrb[48].mxu1 }
 0x8a1   :  { %v2313_v21 = vpop.f32.mrb[49].mxu1 }
 0x8a2   :  { %v2314_v29 = vadd.f32 %v2313_v21, %v2312_v19  ;;  %v2315_v22 = vpop.f32.mrb[50].mxu1 }
 0x8a3   :  { %v2316_v23 = vpop.f32.mrb[51].mxu1 }
 0x8a4   :  { %v1773_v16 = vadd.f32 %v2314_v29, %v1641_v20  ;;  %v2317_v24 = vadd.f32 %v2316_v23, %v2315_v22 }
 0x8a6   :  { %v1821_v33 = vmax.f32 %v1773_v16, 0.0  ;;  %v1776_v35 = vadd.f32 %v2317_v24, %v1641_v20 }
 0x8a8   :  { %v3297_v28 = vmax.f32 %v1776_v35, 0.0  ;;  %v1823_v41 = vmul.f32 %v1821_v33, %v1821_v33 }
 0x8aa   :  { %1825 = vadd.xlane.f32.xlu0 %v1823_v41  ;;  %v1824_v36 = vmul.f32 %v3297_v28, %v3297_v28 }
 0x8ac   :  { %1827 = vadd.xlane.f32.xlu1 %v1824_v36 }
 0x8ae   :  { %1554 = vadd.xlane.f32.xlu0 %v1536_v34 }
 0x8b0   :  { %1556 = vadd.xlane.f32.xlu1 %v1537_v42 }
 0x8b2   :  { %1558 = vadd.xlane.f32.xlu0 %v1538_v38 }
 0x8b4   :  { %1560 = vadd.xlane.f32.xlu1 %v1539_v45 }
 0x8b6   :  { %1562 = vadd.xlane.f32.xlu0 %v1540_v47 }
 0x8b8   :  { %1564 = vadd.xlane.f32.xlu1 %v1541_v51 }
 0x8ba   :  { %1566 = vadd.xlane.f32.xlu0 %v1542_v49 }
 0x8bc   :  { %1568 = vadd.xlane.f32.xlu1 %v1543_v55 }
 0x8be   :  { %1570 = vadd.xlane.f32.xlu0 %v1544_v56 }
 0x8c0   :  { %1572 = vadd.xlane.f32.xlu1 %v1545_v57 }
 0x8c2   :  { %1574 = vadd.xlane.f32.xlu0 %v1546_v58 }
 0x8c4   :  { %1576 = vadd.xlane.f32.xlu1 %v1547_v46 }
 0x8c6   :  { %1578 = vadd.xlane.f32.xlu0 %v1548_v43 }
 0x8c8   :  { %1580 = vadd.xlane.f32.xlu1 %v1549_v50 }
 0x937   :  { %v1826_v54 = vpop.xlane.xlu0 %1825 }
 0x938   :  { %2702 = vrsqrt.f32 %v1826_v54  ;;  %vm1829_vm0 = vcmp.eq.f32.partialorder %v1826_v54, 0.0 }
 0x939   :  { %v1828_v53 = vpop.xlane.xlu1 %1827 }
 0x93a   :  { %2704 = vrsqrt.f32 %v1828_v53  ;;  %vm1830_vm3 = vcmp.eq.f32.partialorder %v1828_v53, 0.0 }
 0x93b   :  { %v1555_v62 = vpop.xlane.xlu0 %1554 }
 0x93c   :  { %v1584_v7 = vmax.f32 %v1555_v62, 1.0 }
 0x93d   :  { %v1557_v63 = vpop.xlane.xlu1 %1556 }
 0x93e   :  { %2706 = vrcp.f32 %v1584_v7  ;;  %v1585_v59 = vmax.f32 %v1557_v63, 1.0 }
 0x93f   :  { %v1559_v1 = vpop.xlane.xlu0 %1558 }
 0x940   :  { %2708 = vrcp.f32 %v1585_v59  ;;  %v1586_v26 = vmax.f32 %v1559_v1, 1.0 }
 0x941   :  { %v1561_v6 = vpop.xlane.xlu1 %1560 }
 0x942   :  { %v2703_v11 = vpop.eup %2702  ;;  %2710 = vrcp.f32 %v1586_v26  ;;  %v1587_v19 = vmax.f32 %v1561_v6, 1.0 }
 0x943   :  { %v1833_v20 = vsel %vm1829_vm0, 1.0, %v2703_v11  ;;  %v1563_v21 = vpop.xlane.xlu0 %1562 }
 0x944   :  { %v2705_v29 = vpop.eup %2704  ;;  %v1835_v22 = vmul.f32 %v1833_v20, %v1821_v33  ;;  %2712 = vrcp.f32 %v1587_v19  ;;  %v1588_v23 = vmax.f32 %v1563_v21, 1.0 }
 0x945   :  { %v1834_v16 = vsel %vm1830_vm3, 1.0, %v2705_v29  ;;  %v1565_v24 = vpop.xlane.xlu1 %1564 }
 0x946   :  { %v1836_v35 = vmul.f32 %v1834_v16, %v3297_v28  ;;  %2714 = vrcp.f32 %v1588_v23  ;;  %v1589_v41 = vmax.f32 %v1565_v24, 1.0  ;;  %v1837_v42 = vadd.f32 %v1835_v22, %v2984_v31 }
 0x947   :  { %v1567_v36 = vpop.xlane.xlu0 %1566 }
 0x948   :  { %v2707_v34 = vpop.eup %2706  ;;  %v1838_v38 = vadd.f32 %v1836_v35, %v2986_v32  ;;  %2716 = vrcp.f32 %v1589_v41  ;;  %v1590_v45 = vmax.f32 %v1567_v36, 1.0 }
 0x949   :  { %v1569_v47 = vpop.xlane.xlu1 %1568  ;;  %v1616_v55 = vmul.f32 %v2707_v34, %v3262_v40 }
 0x94a   :  { %v2709_v51 = vpop.eup %2708  ;;  %v1839_v33 = vpack.c.bf16 %v1838_v38, %v1837_v42  ;;  %2718 = vrcp.f32 %v1590_v45  ;;  %v1591_v49 = vmax.f32 %v1569_v47, 1.0 }
 0x94b   :  { %v1617_v56 = vmul.f32 %v2709_v51, %v3264_v39  ;;  %v1571_v28 = vpop.xlane.xlu0 %1570 }
 0x94c   :  { %v2711_v57 = vpop.eup %2710  ;;  %2527 = vmatpush3.bf16.xpose.msra.mxu0 %v1839_v33  ;;  %2720 = vrcp.f32 %v1591_v49  ;;  %v1592_v58 = vmax.f32 %v1571_v28, 1.0 }
 0x94d   :  { %v1631_v46 = vpack.c.bf16 %v1617_v56, %v1616_v55  ;;  %v1618_v31 = vmul.f32 %v2711_v57, %v3273_v5  ;;  %v1573_v32 = vpop.xlane.xlu1 %1572  ;;  %2532 = vmatprep.subr.bf16.mxu0 %v2858_v0 }
 0x94e   :  { %v2713_v43 = vpop.eup %2712  ;;  %2722 = vrcp.f32 %v1592_v58  ;;  %v1593_v50 = vmax.f32 %v1573_v32, 1.0 }
 0x94f   :  { %1779 = vmatmul.mubr.bf16.gmra.mrb[52].mxu1 %v1631_v46  ;;  %v1619_v54 = vmul.f32 %v2713_v43, %v3277_v14  ;;  %v1575_v40 = vpop.xlane.xlu0 %1574 }
 0x950   :  { %v2715_v53 = vpop.eup %2714  ;;  %1784 = vmatprep.mubr.bf16.mxu1 %v3227_v2  ;;  %2724 = vrcp.f32 %v1593_v50  ;;  %v1594_v39 = vmax.f32 %v1575_v40, 1.0 }
 0x951   :  { %v1632_v62 = vpack.c.bf16 %v1619_v54, %v1618_v31  ;;  %v1620_v7 = vmul.f32 %v2715_v53, %v3271_v12  ;;  %v1577_v63 = vpop.xlane.xlu1 %1576 }
 0x952   :  { %v2717_v5 = vpop.eup %2716  ;;  %2726 = vrcp.f32 %v1594_v39  ;;  %v1595_v59 = vmax.f32 %v1577_v63, 1.0 }
 0x953   :  { %2529 = vmatmul.mubr.bf16.vlgmr.msra.gmra.mrb[64].mxu0 %v1839_v33  ;;  %v1621_v1 = vmul.f32 %v2717_v5, %v3275_v13  ;;  %v1579_v26 = vpop.xlane.xlu0 %1578 }
 0x954   :  { %v2719_v6 = vpop.eup %2718  ;;  %2728 = vrcp.f32 %v1595_v59  ;;  %v1596_v14 = vmax.f32 %v1579_v26, 1.0  ;;  %2534 = vmatprep.mubr.msk.bf16.mxu0 %vm2859_vm2, %v2858_v0 }
 0x955   :  { %v1633_v2 = vpack.c.bf16 %v1621_v1, %v1620_v7  ;;  %v1622_v11 = vmul.f32 %v2719_v6, %v3281_v61  ;;  %v1581_v19 = vpop.xlane.xlu1 %1580 }
 0x956   :  { %v2721_v20 = vpop.eup %2720  ;;  %2730 = vrcp.f32 %v1596_v14  ;;  %v1597_v12 = vmax.f32 %v1581_v19, 1.0  ;;  %v1974_v19 = vsub.s32 2, %v3012_v3 }
 0x957   :  { %1785 = vmatmul.mubr.bf16.gmra.mrb[56].mxu1 %v1632_v62  ;;  %v1623_v21 = vmul.f32 %v2721_v20, %v3285_v17 }
 0x958   :  { %v2723_v29 = vpop.eup %2722  ;;  %1790 = vmatprep.mubr.bf16.mxu1 %v3232_v37  ;;  %2732 = vrcp.f32 %v1597_v12 }
 0x959   :  { %v1634_v13 = vpack.c.bf16 %v1623_v21, %v1622_v11  ;;  %v1624_v22 = vmul.f32 %v2723_v29, %v3279_v30 }
 0x95a   :  { %v2725_v23 = vpop.eup %2724 }
 0x95b   :  { %v1625_v16 = vmul.f32 %v2725_v23, %v3283_v8  ;;  %v3376_v8 = vadd.s32 8, %v3012_v3 }
 0x95c   :  { %v2727_v24 = vpop.eup %2726 }
 0x95d   :  { %v1635_v35 = vpack.c.bf16 %v1625_v16, %v1624_v22  ;;  %v1626_v61 = vmul.f32 %v2727_v24, %v3289_v18 }
 0x95e   :  { %v2729_v41 = vpop.eup %2728 }
 0x95f   :  { %1791 = vmatmul.mubr.bf16.gmra.mrb[60].mxu1 %v1633_v2  ;;  %v1627_v36 = vmul.f32 %v2729_v41, %v3293_v52 }
 0x960   :  { %v2731_v34 = vpop.eup %2730  ;;  %1796 = vmatprep.mubr.bf16.mxu1 %v3237_v44  ;;  %v1882_v44 = vld [vmem:[%s3419_s6] sm:$0xf] }
 0x961   :  { %v1636_v17 = vpack.c.bf16 %v1627_v36, %v1626_v61  ;;  %v1628_v37 = vmul.f32 %v2731_v34, %v3287_v48  ;;  %v1889_v48 = vrot.slane %v1882_v44, %v3132_v60  ;;  %v1900_v11 = vrot.slane %v1882_v44, %v3015_v4 }
 0x962   :  { %v2733_v42 = vpop.eup %2732 }
 0x963   :  { %v1629_v30 = vmul.f32 %v2733_v42, %v3291_v27  ;;  %vm1890_vm4 = vcmp.eq.s32.totalorder %v3012_v3, %v1889_v48  ;;  %vm1891_vm5 = vcmp.eq.s32.totalorder %v3376_v8, %v1889_v48  ;;  %vm1901_vm11 = vcmp.eq.s32.totalorder %v3012_v3, %v1900_v11 }
 0x964   :  { %vm2142_vm6 = vmpackc.low %vm1891_vm5, %vm1890_vm4  ;;  %vm1902_vm12 = vcmp.eq.s32.totalorder %v3376_v8, %v1900_v11  ;;  %v2140_v20 = vsel %vm1901_vm11, 1.0, %v2858_v0 }
 0x965   :  { %v1637_v38 = vpack.c.bf16 %v1629_v30, %v1628_v37  ;;  %v2141_v21 = vsel %vm1902_vm12, 1.0, %v2858_v0 }
 0x967   :  { %1797 = vmatmul.mubr.bf16.gmra.mrb[64].mxu1 %v1634_v13  ;;  %v1975_v13 = vrot.slane %v1882_v44, %v1974_v19 }
 0x968   :  { %1802 = vmatprep.mubr.bf16.mxu1 %v3242_v9  ;;  %v2860_v9 = vmov 1.0|1.0  }
 0x969   :  { %2533 = vmatpush3.bf16.msk.msra.mxu0 %vm2142_vm6, %v2860_v9  ;;  %vm1976_vm13 = vcmp.eq.s32.totalorder %v3012_v3, %v1975_v13  ;;  %vm1977_vm14 = vcmp.eq.s32.totalorder %v3376_v8, %v1975_v13 }
 0x96a   :  { %2538 = vmatprep.subr.bf16.mxu0 %v2858_v0  ;;  %v2147_v61 = vsel %vm1976_vm13, 1.0, %v2858_v0  ;;  %v2148_v36 = vsel %vm1977_vm14, 1.0, %v2858_v0 }
 0x96f   :  { %1803 = vmatmul.mubr.bf16.gmra.mrb[68].mxu1 %v1635_v35 }
 0x970   :  { %1808 = vmatprep.mubr.bf16.mxu1 %v3247_v10  ;;  %v1963_v10 = vsub.s32 3, %v3012_v3 }
 0x972   :  { %v1964_v18 = vrot.slane %v1882_v44, %v1963_v10 }
 0x974   :  { %vm1965_vm7 = vcmp.eq.s32.totalorder %v3012_v3, %v1964_v18  ;;  %vm1966_vm8 = vcmp.eq.s32.totalorder %v3376_v8, %v1964_v18 }
 0x975   :  { %vm2149_vm10 = vmpackc.low %vm1966_vm8, %vm1965_vm7 }
 0x977   :  { %1809 = vmatmul.mubr.bf16.gmra.mrb[72].mxu1 %v1636_v17 }
 0x978   :  { %1814 = vmatprep.mubr.bf16.mxu1 %v3252_v15 }
 0x97f   :  { %1815 = vmatmul.mubr.bf16.gmra.mrb[76].mxu1 %v1637_v38 }
 0xa22   :  { %v2318_v15 = vpop.f32.mrb[52].mxu1 }
 0xa23   :  { %v2319_v27 = vpop.f32.mrb[53].mxu1 }
 0xa24   :  { %v2321_v52 = vpop.f32.mrb[54].mxu1 }
 0xa25   :  { %v2322_v45 = vpop.f32.mrb[55].mxu1 }
 0xa26   :  { %v1874_v47 = vpop.f32.mrb[64].mxu0 }
 0xa27   :  { %v2530_v60 = vpop.f32.mrb[65].mxu0 }
 0xa28   :  { %v1877_v51 = vpop.f32.mrb[66].mxu0 }
 0xa29   :  { %v1881_v33 = vpack.c.bf16 %v1877_v51, %v1874_v47  ;;  %v2531_v49 = vpop.f32.mrb[67].mxu0 }
 0xa2a   :  { %v2324_v55 = vpop.f32.mrb[56].mxu1 }
 0xa2b   :  { %2535 = vmatmul.mubr.msk.bf16.vlgmr.msra.gmra.mrb[68].mxu0 %vm1907_vm9, %v1881_v33  ;;  %v2325_v56 = vpop.f32.mrb[57].mxu1 }
 0xa2c   :  { %2539 = vmatpush3.bf16.msk.msra.mxu0 %vm2149_vm10, %v2860_v9  ;;  %2540 = vmatprep.mubr.msk.bf16.mxu0 %vm2859_vm2, %v2858_v0  ;;  %v2327_v28 = vpop.f32.mrb[58].mxu1  ;;  %v2033_v0 = vld [vmem:[%s3420_s7] sm:$0x1] }
 0xa2d   :  { %v2328_v57 = vpop.f32.mrb[59].mxu1 }
 0xa32   :  { %v2330_v58 = vpop.f32.mrb[60].mxu1 }
 0xa33   :  { %2541 = vmatmul.mubr.msk.bf16.vlgmr.msra.gmra.mrb[72].mxu0 %vm1907_vm9, %v1881_v33  ;;  %v2331_v46 = vpop.f32.mrb[61].mxu1 }
 0xa34   :  { %v2333_v31 = vpop.f32.mrb[62].mxu1 }
 0xa35   :  { %v2334_v32 = vpop.f32.mrb[63].mxu1 }
 0xa3a   :  { %v2336_v43 = vpop.f32.mrb[64].mxu1 }
 0xa3b   :  { %v2337_v50 = vpop.f32.mrb[65].mxu1 }
 0xa3c   :  { %v2339_v54 = vpop.f32.mrb[66].mxu1 }
 0xa3d   :  { %v2340_v40 = vpop.f32.mrb[67].mxu1 }
 0xa42   :  { %v2342_v53 = vpop.f32.mrb[68].mxu1 }
 0xa43   :  { %v2343_v39 = vpop.f32.mrb[69].mxu1 }
 0xa44   :  { %v2345_v62 = vpop.f32.mrb[70].mxu1 }
 0xa45   :  { %v2346_v7 = vpop.f32.mrb[71].mxu1 }
 0xa4a   :  { %v2348_v63 = vpop.f32.mrb[72].mxu1 }
 0xa4b   :  { %v2349_v5 = vpop.f32.mrb[73].mxu1 }
 0xa4c   :  { %v2351_v59 = vpop.f32.mrb[74].mxu1 }
 0xa4d   :  { %v2352_v1 = vpop.f32.mrb[75].mxu1 }
 0xa52   :  { %v2354_v26 = vpop.f32.mrb[76].mxu1 }
 0xa53   :  { %v2355_v6 = vpop.f32.mrb[77].mxu1 }
 0xa54   :  { %v2357_v14 = vpop.f32.mrb[78].mxu1 }
 0xa55   :  { %v2358_v2 = vpop.f32.mrb[79].mxu1 }
 0xafe   :  { %v1945_v12 = vpop.f32.mrb[68].mxu0 }
 0xaff   :  { %v2536_v29 = vpop.f32.mrb[69].mxu0  ;;  %v1952_v23 = vmul.f32 %v2140_v20, %v1945_v12 }
 0xb00   :  { %v1948_v22 = vpop.f32.mrb[70].mxu0 }
 0xb01   :  { %v1953_v16 = vmul.f32 %v2141_v21, %v1948_v22  ;;  %v2537_v24 = vpop.f32.mrb[71].mxu0 }
 0xb03   :  { %v1954_v35 = vadd.f32 %v1953_v16, %v1952_v23 }
 0xb05   :  { %v1955_v4 = vrot.slane %v1954_v35, 4 }
 0xb06   :  { %v2016_v41 = vpop.f32.mrb[72].mxu0 }
 0xb07   :  { %v1956_v34 = vadd.f32 %v1955_v4, %v1954_v35  ;;  %v2542_v17 = vpop.f32.mrb[73].mxu0  ;;  %v2023_v42 = vmul.f32 %v2147_v61, %v2016_v41 }
 0xb08   :  { %v2019_v37 = vpop.f32.mrb[74].mxu0 }
 0xb09   :  { %v2024_v30 = vmul.f32 %v2148_v36, %v2019_v37  ;;  %v2543_v38 = vpop.f32.mrb[75].mxu0  ;;  %v1957_v44 = vrot.slane %v1956_v34, 2 }
 0xb0b   :  { %v2025_v48 = vadd.f32 %v2024_v30, %v2023_v42  ;;  %v1958_v10 = vadd.f32 %v1957_v44, %v1956_v34 }
 0xb0d   :  { %v2026_v9 = vrot.slane %v2025_v48, 4  ;;  %v1959_v18 = vrot.slane %v1958_v10, 1 }
 0xb0f   :  { %v2027_v15 = vadd.f32 %v2026_v9, %v2025_v48  ;;  %v1960_v52 = vadd.f32 %v1959_v18, %v1958_v10 }
 0xb11   :  { %v2028_v3 = vrot.slane %v2027_v15, 2 }
 0xb13   :  { %v2029_v8 = vadd.f32 %v2028_v3, %v2027_v15 }
 0xb15   :  { %v2030_v27 = vrot.slane %v2029_v8, 1 }
 0xb17   :  { %v2031_v45 = vadd.f32 %v2030_v27, %v2029_v8 }
 0xb19   :  { %v2032_v47 = vsub.f32 %v2031_v45, %v1960_v52 }
 0xb1b   :  { %v2034_v60 = vadd.f32 %v2033_v0, %v2032_v47 }
 0xb1d   :  { %v2035_v51 = vadd.f32 1.0, %v2034_v60 }
 0xb1f   :  { %v2036_v33 = vmax.f32 %v2035_v51, 0.0 }
 0xb21   :  { %v2038_v49 = vsel %vm2037_vm15, %v2036_v33, 0.0 }
 0xb22   :  { %2039 = vst [vmem:[#allocation10] sm:$0x1] %v2038_v49 }
 0xb23   :  { %2833 = shalt.err (!%p2830_p8)
}
 0xb24   :  { %s2834_s21 = scalar_lea.hbm %s3421_s8, 16 }
 0xb25   :  { %p2835_p9 = scmp.ne.s32.totalorder %s3421_s8, %s2834_s21  ;;  %p2838_p10 = scmp.lt.u32.totalorder %s2834_s21, %s3421_s8 }
 0xb27   :  { %p2840_p11 = pnand %p2838_p10, %p2835_p9 }
 0xb29   :  { %2843 = shalt.err (!%p2840_p11)
}
 0xb2a   :  { %2049 = dma.vmem_to_hbm [thread:$0]  %s2047_s15, 16, %s3421_s8, [#allocation4]  }
 0xb2b   :  { %2850 = dma.done.wait [#allocation4], 16  }
 0xb2c   :  { %2851 = vsyncadd [#allocation4], 4294967280 }
 0xb2d   :  { %2053 = vsyncpa [#allocation3], 1 }
 0xb2e   :  { %2054 = vsyncpa [#allocation6], 1 }
 0xb2f   :  { %2055 = vsyncpa [#allocation9], 1 }
 0xb30   :  { %2056 = vsyncpa [#allocation4], 1 }

</bundles_post_ra>
